<compile_context>
chip_gen: v7x
topology: tpu7x:2x2x1
jax: 0.10.0
libtpu: 0.0.40
codegen_flags: <defaults>
</compile_context>

<pallas_src>
import functools

import numpy as np
import jax
import jax.numpy as jnp
from jax import lax
from jax.experimental import pallas as pl
from jax.experimental.pallas import tpu as pltpu

KH = KW = 5
HALO = 2                    # conv padding
EPS = 1e-5
_LANE = 128


def _round_up(x, m):
    return ((x + m - 1) // m) * m


def _attention_kernel(x_ref, w1_ref, b1_ref, w2_ref, b2_ref, out_ref,
                      patch_ref, *, off, wp):
    """One grid step processes `Bt` images.

    x_ref     : (Bt, 2C, LBUF)   f32  concatenated rgb+aux, zero-padded, flattened
    w1_ref    : (K, 25*2C)       f32  BN-folded 5x5 conv weights (tap-major im2col)
    b1_ref    : (K, 1)           f32  BN-folded conv bias
    w2_ref    : (2, K)           f32  1x1 conv weights
    b2_ref    : (2, 1)           f32
    out_ref   : (Bt, C+2, NOUT)  f32  rows [0,C): merged, rows [C,C+2): attention
    patch_ref : (25*2C, Bt*NOUT) f32  im2col scratch shared by all Bt images
    """
    Bt, C2, _ = x_ref.shape
    C = C2 // 2
    NOUT = out_ref.shape[-1]

    # ---- im2col: 25 lane-shifted, full-sublane-tile (2C rows) copies per image ----
    for b in range(Bt):
        col0 = b * NOUT
        for t in range(KH * KW):
            dy, dx = t // KW, t % KW
            s = (dy - HALO) * wp + (dx - HALO)           # flat tap shift
            patch_ref[t * C2:(t + 1) * C2, col0:col0 + NOUT] = (
                x_ref[b, :, off + s: off + s + NOUT])

    # ---- 5x5 conv (BN folded) as ONE batched MXU matmul, then ReLU ----
    y = jnp.dot(w1_ref[...], patch_ref[...],
                preferred_element_type=jnp.float32)       # (K, Bt*NOUT)
    y = jnp.maximum(y + b1_ref[...], 0.0)

    # ---- 1x1 conv + sigmoid (batched over all images of this step) ----
    scores = jnp.dot(w2_ref[...], y,
                     preferred_element_type=jnp.float32) + b2_ref[...]
    attw = jax.nn.sigmoid(scores)                         # (2, Bt*NOUT)

    # ---- attention-weighted merge of the two streams ----
    for b in range(Bt):
        col0 = b * NOUT
        a = attw[:, col0:col0 + NOUT]                     # (2, NOUT)
        rgb = x_ref[b, :C, off:off + NOUT]                # (C, NOUT)
        aux = x_ref[b, C:2 * C, off:off + NOUT]
        out_ref[b, :C, :] = rgb * a[0:1, :] + aux * a[1:2, :]
        out_ref[b, C:C + 2, :] = a


def multi_stream_attention(rgb_nchw, aux_nchw, params):
    """Returns (merged_features, pre_attention_outputs, attention_weights) in
    PyTorch NCHW layout, matching the reference module (BatchNorm in eval mode)."""
    rgb_nchw = rgb_nchw.astype(jnp.float32)
    aux_nchw = aux_nchw.astype(jnp.float32)
    B, C, H, W = rgb_nchw.shape
    Hp, Wp = H + 2 * HALO, W + 2 * HALO
    PAD = Hp * Wp                                # padded flat spatial size
    NOUT = _round_up(PAD, _LANE)                 # lane-dense output width
    SMAX = HALO * Wp + HALO                      # largest |tap shift|
    OFF = _round_up(SMAX, _LANE)                 # lane-aligned left slack
    LBUF = _round_up(OFF + NOUT + SMAX, _LANE)   # per-image flat buffer length
    # Tap reads span [OFF - SMAX, OFF + NOUT + SMAX); any flat-index wrap across
    # padded rows only affects output lanes inside the cropped halo border.
    assert OFF >= SMAX and LBUF >= OFF + NOUT + SMAX

    # ---- single sublane-dense flat buffer: rgb+aux concatenated on channels ----
    x = jnp.concatenate([rgb_nchw, aux_nchw], axis=1)            # (B, 2C, H, W)
    xp = jnp.pad(x, ((0, 0), (0, 0), (HALO, HALO), (HALO, HALO)))
    x_buf = jnp.pad(xp.reshape(B, 2 * C, PAD),
                    ((0, 0), (0, 0), (OFF, LBUF - OFF - PAD)))

    # ---- fold eval-mode BatchNorm + conv bias into the conv weights ----
    w1_oihw = params["w1"].astype(jnp.float32)                   # (K, 2C, 5, 5)
    K = w1_oihw.shape[0]
    scale = params["gamma"] * lax.rsqrt(params["running_var"] + EPS)   # (K,)
    w1s = w1_oihw * scale[:, None, None, None]
    b1f = ((params["b1"] - params["running_mean"]) * scale
           + params["beta"]).reshape(K, 1).astype(jnp.float32)
    # im2col weight layout: contraction row = tap*2C + concat-channel (tap-major).
    NROWS = KH * KW * 2 * C
    w1_mat = jnp.transpose(w1s, (0, 2, 3, 1)).reshape(K, NROWS)  # (K, 25*2C)
    w2_mat = params["w2"].reshape(2, K).astype(jnp.float32)      # (2, K)
    b2 = params["b2"].reshape(2, 1).astype(jnp.float32)

    # ---- per-step batch: keep grid length >= 2 (v7x megacore), cap unroll ----
    Bt = next((bt for bt in (4, 2, 1) if B % bt == 0 and B // bt >= 2), 1)
    grid = (B // Bt,)

    # ---- explicit VMEM budget: double-buffered in/out blocks + im2col scratch ----
    vmem_need = (2 * Bt * 2 * C * LBUF * 4          # input blocks (x2 pipeline bufs)
                 + 2 * Bt * 8 * NOUT * 4            # output blocks (sublane-padded)
                 + NROWS * Bt * NOUT * 4            # im2col scratch
                 + (NROWS * K + 3 * K + 4) * 4)     # weights / biases
    vmem_limit = int(min(max(2 * vmem_need, 16 << 20), 64 << 20))

    kernel = functools.partial(_attention_kernel, off=OFF, wp=Wp)

    out_buf = pl.pallas_call(
        kernel,
        out_shape=jax.ShapeDtypeStruct((B, C + 2, NOUT), jnp.float32),
        grid_spec=pltpu.PrefetchScalarGridSpec(
            num_scalar_prefetch=0,
            grid=grid,
            in_specs=[
                pl.BlockSpec((Bt, 2 * C, LBUF), lambda g: (g, 0, 0)),
                pl.BlockSpec((K, NROWS), lambda g: (0, 0)),
                pl.BlockSpec((K, 1), lambda g: (0, 0)),
                pl.BlockSpec((2, K), lambda g: (0, 0)),
                pl.BlockSpec((2, 1), lambda g: (0, 0)),
            ],
            out_specs=pl.BlockSpec((Bt, C + 2, NOUT), lambda g: (g, 0, 0)),
            scratch_shapes=[pltpu.VMEM((NROWS, Bt * NOUT), jnp.float32)],
        ),
        compiler_params=pltpu.CompilerParams(
            dimension_semantics=("parallel",),
            vmem_limit_bytes=vmem_limit),
    )(x_buf, w1_mat, b1f, w2_mat, b2)

    # ---- crop the lane-dense output slab back to NCHW (cheap slices) ----
    out = out_buf[:, :, :PAD].reshape(B, C + 2, Hp, Wp)[
        :, :, HALO:HALO + H, HALO:HALO + W]
    merged = out[:, :C]
    attw = out[:, C:C + 2]
    pre_attention_outputs = [rgb_nchw, aux_nchw]   # module returns inputs untouched
    return merged, pre_attention_outputs, attw


def _reference(rgb_nchw, aux_nchw, params):
    """Pure-JAX reference matching the PyTorch module (BN in eval mode)."""
    concat = jnp.concatenate([rgb_nchw, aux_nchw], axis=1)
    y = lax.conv_general_dilated(
        concat, params["w1"], (1, 1), "SAME",
        dimension_numbers=("NCHW", "OIHW", "NCHW"),
        precision=lax.Precision.HIGHEST)
    y = y + params["b1"][None, :, None, None]
    inv = lax.rsqrt(params["running_var"] + EPS)
    y = ((y - params["running_mean"][None, :, None, None])
         * inv[None, :, None, None] * params["gamma"][None, :, None, None]
         + params["beta"][None, :, None, None])
    y = jnp.maximum(y, 0.0)
    s = lax.conv_general_dilated(
        y, params["w2"], (1, 1), "SAME",
        dimension_numbers=("NCHW", "OIHW", "NCHW"),
        precision=lax.Precision.HIGHEST)
    s = s + params["b2"][None, :, None, None]
    attw = jax.nn.sigmoid(s)
    merged = rgb_nchw * attw[:, 0:1] + aux_nchw * attw[:, 1:2]
    return merged, attw


if __name__ == "__main__":
    # Small shapes consistent with the module: in_channels=4, K=8, 16x16 maps.
    B, C, H, W, K = 2, 4, 16, 16, 8
    key = jax.random.PRNGKey(0)
    k_rgb, k_aux, k_w1, k_b1, k_w2, k_b2 = jax.random.split(key, 6)

    rgb_nchw = jax.random.normal(k_rgb, (B, C, H, W), dtype=jnp.float32)
    aux_nchw = jax.random.normal(k_aux, (B, C, H, W), dtype=jnp.float32)

    params = {
        "w1": jax.random.normal(k_w1, (K, 2 * C, 5, 5), jnp.float32) * 0.05,
        "b1": jax.random.normal(k_b1, (K,), jnp.float32) * 0.05,
        # BatchNorm2d freshly-initialised params / running stats:
        "gamma": jnp.ones((K,), jnp.float32),
        "beta": jnp.zeros((K,), jnp.float32),
        "running_mean": jnp.zeros((K,), jnp.float32),
        "running_var": jnp.ones((K,), jnp.float32),
        "w2": jax.random.normal(k_w2, (2, K, 1, 1), jnp.float32) * 0.1,
        "b2": jax.random.normal(k_b2, (2,), jnp.float32) * 0.1,
    }

    merged, pre_attn, attw = multi_stream_attention(rgb_nchw, aux_nchw, params)
    jax.block_until_ready((merged, attw))

    ref_merged, ref_attw = _reference(rgb_nchw, aux_nchw, params)
    np.testing.assert_allclose(np.asarray(attw), np.asarray(ref_attw),
                               rtol=5e-3, atol=5e-3)
    np.testing.assert_allclose(np.asarray(merged), np.asarray(ref_merged),
                               rtol=5e-3, atol=5e-3)
    assert pre_attn[0].shape == (B, C, H, W) and pre_attn[1].shape == (B, C, H, W)

    print("KERNEL_OK")
</pallas_src>

<mosaic_0001>
module attributes {stable_mosaic.version = 11 : i64} {
  func.func @_attention_kernel(%arg0: i32, %arg1: memref<1x8x768xf32, #tpu.memory_space<vmem>>, %arg2: memref<8x200xf32, #tpu.memory_space<vmem>>, %arg3: memref<8x1xf32, #tpu.memory_space<vmem>>, %arg4: memref<2x8xf32, #tpu.memory_space<vmem>>, %arg5: memref<2x1xf32, #tpu.memory_space<vmem>>, %arg6: memref<1x6x512xf32, #tpu.memory_space<vmem>>, %arg7: memref<200x512xf32, #tpu.memory_space<vmem>>) attributes {dimension_semantics = [#tpu.dimension_semantics<parallel>], iteration_bounds = array<i64: 2>, scalar_prefetch = 0 : i64, scratch_operands = 1 : i64, tpu.core_type = #tpu.core_type<tc>, window_params = [{transform_indices = @transform_0, window_bounds = array<i64: 1, 8, 768>}, {pipeline_mode = #tpu.pipeline_mode<synchronous>, transform_indices = @transform_1, window_bounds = array<i64: 8, 200>}, {pipeline_mode = #tpu.pipeline_mode<synchronous>, transform_indices = @transform_2, window_bounds = array<i64: 8, 1>}, {pipeline_mode = #tpu.pipeline_mode<synchronous>, transform_indices = @transform_3, window_bounds = array<i64: 2, 8>}, {pipeline_mode = #tpu.pipeline_mode<synchronous>, transform_indices = @transform_4, window_bounds = array<i64: 2, 1>}, {transform_indices = @transform_5, window_bounds = array<i64: 1, 6, 512>}]} {
    %c0 = arith.constant 0 : index
    %c0_0 = arith.constant 0 : index
    %c86 = arith.constant 86 : index
    %0 = vector.load %arg1[%c0, %c0_0, %c86] : memref<1x8x768xf32, #tpu.memory_space<vmem>>, vector<1x8x512xf32>
    %1 = vector.shape_cast %0 : vector<1x8x512xf32> to vector<8x512xf32>
    %c0_1 = arith.constant 0 : index
    %c0_2 = arith.constant 0 : index
    %2 = vector.load %arg7[%c0_1, %c0_2] : memref<200x512xf32, #tpu.memory_space<vmem>>, vector<8x512xf32>
    tpu.vector_store %arg7[%c0_1, %c0_2], %1 {strides = array<i32>} : memref<200x512xf32, #tpu.memory_space<vmem>>, vector<8x512xf32>,
    %c0_3 = arith.constant 0 : index
    %c0_4 = arith.constant 0 : index
    %c87 = arith.constant 87 : index
    %3 = vector.load %arg1[%c0_3, %c0_4, %c87] : memref<1x8x768xf32, #tpu.memory_space<vmem>>, vector<1x8x512xf32>
    %4 = vector.shape_cast %3 : vector<1x8x512xf32> to vector<8x512xf32>
    %c8 = arith.constant 8 : index
    %c0_5 = arith.constant 0 : index
    %5 = vector.load %arg7[%c8, %c0_5] : memref<200x512xf32, #tpu.memory_space<vmem>>, vector<8x512xf32>
    tpu.vector_store %arg7[%c8, %c0_5], %4 {strides = array<i32>} : memref<200x512xf32, #tpu.memory_space<vmem>>, vector<8x512xf32>,
    %c0_6 = arith.constant 0 : index
    %c0_7 = arith.constant 0 : index
    %c88 = arith.constant 88 : index
    %6 = vector.load %arg1[%c0_6, %c0_7, %c88] : memref<1x8x768xf32, #tpu.memory_space<vmem>>, vector<1x8x512xf32>
    %7 = vector.shape_cast %6 : vector<1x8x512xf32> to vector<8x512xf32>
    %c16 = arith.constant 16 : index
    %c0_8 = arith.constant 0 : index
    %8 = vector.load %arg7[%c16, %c0_8] : memref<200x512xf32, #tpu.memory_space<vmem>>, vector<8x512xf32>
    tpu.vector_store %arg7[%c16, %c0_8], %7 {strides = array<i32>} : memref<200x512xf32, #tpu.memory_space<vmem>>, vector<8x512xf32>,
    %c0_9 = arith.constant 0 : index
    %c0_10 = arith.constant 0 : index
    %c89 = arith.constant 89 : index
    %9 = vector.load %arg1[%c0_9, %c0_10, %c89] : memref<1x8x768xf32, #tpu.memory_space<vmem>>, vector<1x8x512xf32>
    %10 = vector.shape_cast %9 : vector<1x8x512xf32> to vector<8x512xf32>
    %c24 = arith.constant 24 : index
    %c0_11 = arith.constant 0 : index
    %11 = vector.load %arg7[%c24, %c0_11] : memref<200x512xf32, #tpu.memory_space<vmem>>, vector<8x512xf32>
    tpu.vector_store %arg7[%c24, %c0_11], %10 {strides = array<i32>} : memref<200x512xf32, #tpu.memory_space<vmem>>, vector<8x512xf32>,
    %c0_12 = arith.constant 0 : index
    %c0_13 = arith.constant 0 : index
    %c90 = arith.constant 90 : index
    %12 = vector.load %arg1[%c0_12, %c0_13, %c90] : memref<1x8x768xf32, #tpu.memory_space<vmem>>, vector<1x8x512xf32>
    %13 = vector.shape_cast %12 : vector<1x8x512xf32> to vector<8x512xf32>
    %c32 = arith.constant 32 : index
    %c0_14 = arith.constant 0 : index
    %14 = vector.load %arg7[%c32, %c0_14] : memref<200x512xf32, #tpu.memory_space<vmem>>, vector<8x512xf32>
    tpu.vector_store %arg7[%c32, %c0_14], %13 {strides = array<i32>} : memref<200x512xf32, #tpu.memory_space<vmem>>, vector<8x512xf32>,
    %c0_15 = arith.constant 0 : index
    %c0_16 = arith.constant 0 : index
    %c106 = arith.constant 106 : index
    %15 = vector.load %arg1[%c0_15, %c0_16, %c106] : memref<1x8x768xf32, #tpu.memory_space<vmem>>, vector<1x8x512xf32>
    %16 = vector.shape_cast %15 : vector<1x8x512xf32> to vector<8x512xf32>
    %c40 = arith.constant 40 : index
    %c0_17 = arith.constant 0 : index
    %17 = vector.load %arg7[%c40, %c0_17] : memref<200x512xf32, #tpu.memory_space<vmem>>, vector<8x512xf32>
    tpu.vector_store %arg7[%c40, %c0_17], %16 {strides = array<i32>} : memref<200x512xf32, #tpu.memory_space<vmem>>, vector<8x512xf32>,
    %c0_18 = arith.constant 0 : index
    %c0_19 = arith.constant 0 : index
    %c107 = arith.constant 107 : index
    %18 = vector.load %arg1[%c0_18, %c0_19, %c107] : memref<1x8x768xf32, #tpu.memory_space<vmem>>, vector<1x8x512xf32>
    %19 = vector.shape_cast %18 : vector<1x8x512xf32> to vector<8x512xf32>
    %c48 = arith.constant 48 : index
    %c0_20 = arith.constant 0 : index
    %20 = vector.load %arg7[%c48, %c0_20] : memref<200x512xf32, #tpu.memory_space<vmem>>, vector<8x512xf32>
    tpu.vector_store %arg7[%c48, %c0_20], %19 {strides = array<i32>} : memref<200x512xf32, #tpu.memory_space<vmem>>, vector<8x512xf32>,
    %c0_21 = arith.constant 0 : index
    %c0_22 = arith.constant 0 : index
    %c108 = arith.constant 108 : index
    %21 = vector.load %arg1[%c0_21, %c0_22, %c108] : memref<1x8x768xf32, #tpu.memory_space<vmem>>, vector<1x8x512xf32>
    %22 = vector.shape_cast %21 : vector<1x8x512xf32> to vector<8x512xf32>
    %c56 = arith.constant 56 : index
    %c0_23 = arith.constant 0 : index
    %23 = vector.load %arg7[%c56, %c0_23] : memref<200x512xf32, #tpu.memory_space<vmem>>, vector<8x512xf32>
    tpu.vector_store %arg7[%c56, %c0_23], %22 {strides = array<i32>} : memref<200x512xf32, #tpu.memory_space<vmem>>, vector<8x512xf32>,
    %c0_24 = arith.constant 0 : index
    %c0_25 = arith.constant 0 : index
    %c109 = arith.constant 109 : index
    %24 = vector.load %arg1[%c0_24, %c0_25, %c109] : memref<1x8x768xf32, #tpu.memory_space<vmem>>, vector<1x8x512xf32>
    %25 = vector.shape_cast %24 : vector<1x8x512xf32> to vector<8x512xf32>
    %c64 = arith.constant 64 : index
    %c0_26 = arith.constant 0 : index
    %26 = vector.load %arg7[%c64, %c0_26] : memref<200x512xf32, #tpu.memory_space<vmem>>, vector<8x512xf32>
    tpu.vector_store %arg7[%c64, %c0_26], %25 {strides = array<i32>} : memref<200x512xf32, #tpu.memory_space<vmem>>, vector<8x512xf32>,
    %c0_27 = arith.constant 0 : index
    %c0_28 = arith.constant 0 : index
    %c110 = arith.constant 110 : index
    %27 = vector.load %arg1[%c0_27, %c0_28, %c110] : memref<1x8x768xf32, #tpu.memory_space<vmem>>, vector<1x8x512xf32>
    %28 = vector.shape_cast %27 : vector<1x8x512xf32> to vector<8x512xf32>
    %c72 = arith.constant 72 : index
    %c0_29 = arith.constant 0 : index
    %29 = vector.load %arg7[%c72, %c0_29] : memref<200x512xf32, #tpu.memory_space<vmem>>, vector<8x512xf32>
    tpu.vector_store %arg7[%c72, %c0_29], %28 {strides = array<i32>} : memref<200x512xf32, #tpu.memory_space<vmem>>, vector<8x512xf32>,
    %c0_30 = arith.constant 0 : index
    %c0_31 = arith.constant 0 : index
    %c126 = arith.constant 126 : index
    %30 = vector.load %arg1[%c0_30, %c0_31, %c126] : memref<1x8x768xf32, #tpu.memory_space<vmem>>, vector<1x8x512xf32>
    %31 = vector.shape_cast %30 : vector<1x8x512xf32> to vector<8x512xf32>
    %c80 = arith.constant 80 : index
    %c0_32 = arith.constant 0 : index
    %32 = vector.load %arg7[%c80, %c0_32] : memref<200x512xf32, #tpu.memory_space<vmem>>, vector<8x512xf32>
    tpu.vector_store %arg7[%c80, %c0_32], %31 {strides = array<i32>} : memref<200x512xf32, #tpu.memory_space<vmem>>, vector<8x512xf32>,
    %c0_33 = arith.constant 0 : index
    %c0_34 = arith.constant 0 : index
    %c127 = arith.constant 127 : index
    %33 = vector.load %arg1[%c0_33, %c0_34, %c127] : memref<1x8x768xf32, #tpu.memory_space<vmem>>, vector<1x8x512xf32>
    %34 = vector.shape_cast %33 : vector<1x8x512xf32> to vector<8x512xf32>
    %c88_35 = arith.constant 88 : index
    %c0_36 = arith.constant 0 : index
    %35 = vector.load %arg7[%c88_35, %c0_36] : memref<200x512xf32, #tpu.memory_space<vmem>>, vector<8x512xf32>
    tpu.vector_store %arg7[%c88_35, %c0_36], %34 {strides = array<i32>} : memref<200x512xf32, #tpu.memory_space<vmem>>, vector<8x512xf32>,
    %c0_37 = arith.constant 0 : index
    %c0_38 = arith.constant 0 : index
    %c128 = arith.constant 128 : index
    %36 = vector.load %arg1[%c0_37, %c0_38, %c128] : memref<1x8x768xf32, #tpu.memory_space<vmem>>, vector<1x8x512xf32>
    %37 = vector.shape_cast %36 : vector<1x8x512xf32> to vector<8x512xf32>
    %c96 = arith.constant 96 : index
    %c0_39 = arith.constant 0 : index
    %38 = vector.load %arg7[%c96, %c0_39] : memref<200x512xf32, #tpu.memory_space<vmem>>, vector<8x512xf32>
    tpu.vector_store %arg7[%c96, %c0_39], %37 {strides = array<i32>} : memref<200x512xf32, #tpu.memory_space<vmem>>, vector<8x512xf32>,
    %c0_40 = arith.constant 0 : index
    %c0_41 = arith.constant 0 : index
    %c129 = arith.constant 129 : index
    %39 = vector.load %arg1[%c0_40, %c0_41, %c129] : memref<1x8x768xf32, #tpu.memory_space<vmem>>, vector<1x8x512xf32>
    %40 = vector.shape_cast %39 : vector<1x8x512xf32> to vector<8x512xf32>
    %c104 = arith.constant 104 : index
    %c0_42 = arith.constant 0 : index
    %41 = vector.load %arg7[%c104, %c0_42] : memref<200x512xf32, #tpu.memory_space<vmem>>, vector<8x512xf32>
    tpu.vector_store %arg7[%c104, %c0_42], %40 {strides = array<i32>} : memref<200x512xf32, #tpu.memory_space<vmem>>, vector<8x512xf32>,
    %c0_43 = arith.constant 0 : index
    %c0_44 = arith.constant 0 : index
    %c130 = arith.constant 130 : index
    %42 = vector.load %arg1[%c0_43, %c0_44, %c130] : memref<1x8x768xf32, #tpu.memory_space<vmem>>, vector<1x8x512xf32>
    %43 = vector.shape_cast %42 : vector<1x8x512xf32> to vector<8x512xf32>
    %c112 = arith.constant 112 : index
    %c0_45 = arith.constant 0 : index
    %44 = vector.load %arg7[%c112, %c0_45] : memref<200x512xf32, #tpu.memory_space<vmem>>, vector<8x512xf32>
    tpu.vector_store %arg7[%c112, %c0_45], %43 {strides = array<i32>} : memref<200x512xf32, #tpu.memory_space<vmem>>, vector<8x512xf32>,
    %c0_46 = arith.constant 0 : index
    %c0_47 = arith.constant 0 : index
    %c146 = arith.constant 146 : index
    %45 = vector.load %arg1[%c0_46, %c0_47, %c146] : memref<1x8x768xf32, #tpu.memory_space<vmem>>, vector<1x8x512xf32>
    %46 = vector.shape_cast %45 : vector<1x8x512xf32> to vector<8x512xf32>
    %c120 = arith.constant 120 : index
    %c0_48 = arith.constant 0 : index
    %47 = vector.load %arg7[%c120, %c0_48] : memref<200x512xf32, #tpu.memory_space<vmem>>, vector<8x512xf32>
    tpu.vector_store %arg7[%c120, %c0_48], %46 {strides = array<i32>} : memref<200x512xf32, #tpu.memory_space<vmem>>, vector<8x512xf32>,
    %c0_49 = arith.constant 0 : index
    %c0_50 = arith.constant 0 : index
    %c147 = arith.constant 147 : index
    %48 = vector.load %arg1[%c0_49, %c0_50, %c147] : memref<1x8x768xf32, #tpu.memory_space<vmem>>, vector<1x8x512xf32>
    %49 = vector.shape_cast %48 : vector<1x8x512xf32> to vector<8x512xf32>
    %c128_51 = arith.constant 128 : index
    %c0_52 = arith.constant 0 : index
    %50 = vector.load %arg7[%c128_51, %c0_52] : memref<200x512xf32, #tpu.memory_space<vmem>>, vector<8x512xf32>
    tpu.vector_store %arg7[%c128_51, %c0_52], %49 {strides = array<i32>} : memref<200x512xf32, #tpu.memory_space<vmem>>, vector<8x512xf32>,
    %c0_53 = arith.constant 0 : index
    %c0_54 = arith.constant 0 : index
    %c148 = arith.constant 148 : index
    %51 = vector.load %arg1[%c0_53, %c0_54, %c148] : memref<1x8x768xf32, #tpu.memory_space<vmem>>, vector<1x8x512xf32>
    %52 = vector.shape_cast %51 : vector<1x8x512xf32> to vector<8x512xf32>
    %c136 = arith.constant 136 : index
    %c0_55 = arith.constant 0 : index
    %53 = vector.load %arg7[%c136, %c0_55] : memref<200x512xf32, #tpu.memory_space<vmem>>, vector<8x512xf32>
    tpu.vector_store %arg7[%c136, %c0_55], %52 {strides = array<i32>} : memref<200x512xf32, #tpu.memory_space<vmem>>, vector<8x512xf32>,
    %c0_56 = arith.constant 0 : index
    %c0_57 = arith.constant 0 : index
    %c149 = arith.constant 149 : index
    %54 = vector.load %arg1[%c0_56, %c0_57, %c149] : memref<1x8x768xf32, #tpu.memory_space<vmem>>, vector<1x8x512xf32>
    %55 = vector.shape_cast %54 : vector<1x8x512xf32> to vector<8x512xf32>
    %c144 = arith.constant 144 : index
    %c0_58 = arith.constant 0 : index
    %56 = vector.load %arg7[%c144, %c0_58] : memref<200x512xf32, #tpu.memory_space<vmem>>, vector<8x512xf32>
    tpu.vector_store %arg7[%c144, %c0_58], %55 {strides = array<i32>} : memref<200x512xf32, #tpu.memory_space<vmem>>, vector<8x512xf32>,
    %c0_59 = arith.constant 0 : index
    %c0_60 = arith.constant 0 : index
    %c150 = arith.constant 150 : index
    %57 = vector.load %arg1[%c0_59, %c0_60, %c150] : memref<1x8x768xf32, #tpu.memory_space<vmem>>, vector<1x8x512xf32>
    %58 = vector.shape_cast %57 : vector<1x8x512xf32> to vector<8x512xf32>
    %c152 = arith.constant 152 : index
    %c0_61 = arith.constant 0 : index
    %59 = vector.load %arg7[%c152, %c0_61] : memref<200x512xf32, #tpu.memory_space<vmem>>, vector<8x512xf32>
    tpu.vector_store %arg7[%c152, %c0_61], %58 {strides = array<i32>} : memref<200x512xf32, #tpu.memory_space<vmem>>, vector<8x512xf32>,
    %c0_62 = arith.constant 0 : index
    %c0_63 = arith.constant 0 : index
    %c166 = arith.constant 166 : index
    %60 = vector.load %arg1[%c0_62, %c0_63, %c166] : memref<1x8x768xf32, #tpu.memory_space<vmem>>, vector<1x8x512xf32>
    %61 = vector.shape_cast %60 : vector<1x8x512xf32> to vector<8x512xf32>
    %c160 = arith.constant 160 : index
    %c0_64 = arith.constant 0 : index
    %62 = vector.load %arg7[%c160, %c0_64] : memref<200x512xf32, #tpu.memory_space<vmem>>, vector<8x512xf32>
    tpu.vector_store %arg7[%c160, %c0_64], %61 {strides = array<i32>} : memref<200x512xf32, #tpu.memory_space<vmem>>, vector<8x512xf32>,
    %c0_65 = arith.constant 0 : index
    %c0_66 = arith.constant 0 : index
    %c167 = arith.constant 167 : index
    %63 = vector.load %arg1[%c0_65, %c0_66, %c167] : memref<1x8x768xf32, #tpu.memory_space<vmem>>, vector<1x8x512xf32>
    %64 = vector.shape_cast %63 : vector<1x8x512xf32> to vector<8x512xf32>
    %c168 = arith.constant 168 : index
    %c0_67 = arith.constant 0 : index
    %65 = vector.load %arg7[%c168, %c0_67] : memref<200x512xf32, #tpu.memory_space<vmem>>, vector<8x512xf32>
    tpu.vector_store %arg7[%c168, %c0_67], %64 {strides = array<i32>} : memref<200x512xf32, #tpu.memory_space<vmem>>, vector<8x512xf32>,
    %c0_68 = arith.constant 0 : index
    %c0_69 = arith.constant 0 : index
    %c168_70 = arith.constant 168 : index
    %66 = vector.load %arg1[%c0_68, %c0_69, %c168_70] : memref<1x8x768xf32, #tpu.memory_space<vmem>>, vector<1x8x512xf32>
    %67 = vector.shape_cast %66 : vector<1x8x512xf32> to vector<8x512xf32>
    %c176 = arith.constant 176 : index
    %c0_71 = arith.constant 0 : index
    %68 = vector.load %arg7[%c176, %c0_71] : memref<200x512xf32, #tpu.memory_space<vmem>>, vector<8x512xf32>
    tpu.vector_store %arg7[%c176, %c0_71], %67 {strides = array<i32>} : memref<200x512xf32, #tpu.memory_space<vmem>>, vector<8x512xf32>,
    %c0_72 = arith.constant 0 : index
    %c0_73 = arith.constant 0 : index
    %c169 = arith.constant 169 : index
    %69 = vector.load %arg1[%c0_72, %c0_73, %c169] : memref<1x8x768xf32, #tpu.memory_space<vmem>>, vector<1x8x512xf32>
    %70 = vector.shape_cast %69 : vector<1x8x512xf32> to vector<8x512xf32>
    %c184 = arith.constant 184 : index
    %c0_74 = arith.constant 0 : index
    %71 = vector.load %arg7[%c184, %c0_74] : memref<200x512xf32, #tpu.memory_space<vmem>>, vector<8x512xf32>
    tpu.vector_store %arg7[%c184, %c0_74], %70 {strides = array<i32>} : memref<200x512xf32, #tpu.memory_space<vmem>>, vector<8x512xf32>,
    %c0_75 = arith.constant 0 : index
    %c0_76 = arith.constant 0 : index
    %c170 = arith.constant 170 : index
    %72 = vector.load %arg1[%c0_75, %c0_76, %c170] : memref<1x8x768xf32, #tpu.memory_space<vmem>>, vector<1x8x512xf32>
    %73 = vector.shape_cast %72 : vector<1x8x512xf32> to vector<8x512xf32>
    %c192 = arith.constant 192 : index
    %c0_77 = arith.constant 0 : index
    %74 = vector.load %arg7[%c192, %c0_77] : memref<200x512xf32, #tpu.memory_space<vmem>>, vector<8x512xf32>
    tpu.vector_store %arg7[%c192, %c0_77], %73 {strides = array<i32>} : memref<200x512xf32, #tpu.memory_space<vmem>>, vector<8x512xf32>,
    %c0_78 = arith.constant 0 : index
    %c0_79 = arith.constant 0 : index
    %75 = vector.load %arg2[%c0_78, %c0_79] : memref<8x200xf32, #tpu.memory_space<vmem>>, vector<8x200xf32>
    %c0_80 = arith.constant 0 : index
    %c0_81 = arith.constant 0 : index
    %76 = vector.load %arg7[%c0_80, %c0_81] : memref<200x512xf32, #tpu.memory_space<vmem>>, vector<200x512xf32>
    %cst = arith.constant dense<0.000000e+00> : vector<8x512xf32>
    %77 = tpu.matmul %75, %76, %cst {dimension_numbers = #tpu.dot_dimension_numbers<[1], [0], [0], [1], [0, 0, 1, 1], [], []>} : vector<8x200xf32>, vector<200x512xf32>, vector<8x512xf32> -> vector<8x512xf32>
    %c0_82 = arith.constant 0 : index
    %c0_83 = arith.constant 0 : index
    %78 = vector.load %arg3[%c0_82, %c0_83] : memref<8x1xf32, #tpu.memory_space<vmem>>, vector<8x1xf32>
    %79 = vector.broadcast %78 : vector<8x1xf32> to vector<8x512xf32>
    %80 = arith.addf %77, %79 : vector<8x512xf32>
    %cst_84 = arith.constant 0.000000e+00 : f32
    %81 = vector.broadcast %cst_84 : f32 to vector<8x512xf32>
    %82 = arith.maximumf %80, %81 : vector<8x512xf32>
    %c0_85 = arith.constant 0 : index
    %c0_86 = arith.constant 0 : index
    %83 = vector.load %arg4[%c0_85, %c0_86] : memref<2x8xf32, #tpu.memory_space<vmem>>, vector<2x8xf32>
    %cst_87 = arith.constant dense<0.000000e+00> : vector<2x512xf32>
    %84 = tpu.matmul %83, %82, %cst_87 {dimension_numbers = #tpu.dot_dimension_numbers<[1], [0], [0], [1], [0, 0, 1, 1], [], []>} : vector<2x8xf32>, vector<8x512xf32>, vector<2x512xf32> -> vector<2x512xf32>
    %c0_88 = arith.constant 0 : index
    %c0_89 = arith.constant 0 : index
    %85 = vector.load %arg5[%c0_88, %c0_89] : memref<2x1xf32, #tpu.memory_space<vmem>>, vector<2x1xf32>
    %86 = vector.broadcast %85 : vector<2x1xf32> to vector<2x512xf32>
    %87 = arith.addf %84, %86 : vector<2x512xf32>
    %88 = arith.negf %87 : vector<2x512xf32>
    %89 = math.exp %88 : vector<2x512xf32>
    %cst_90 = arith.constant 1.000000e+00 : f32
    %90 = vector.broadcast %cst_90 : f32 to vector<2x512xf32>
    %91 = arith.addf %90, %89 : vector<2x512xf32>
    %92 = arith.divf %90, %91 : vector<2x512xf32>
    %c0_91 = arith.constant 0 : index
    %c0_92 = arith.constant 0 : index
    %c128_93 = arith.constant 128 : index
    %93 = vector.load %arg1[%c0_91, %c0_92, %c128_93] : memref<1x8x768xf32, #tpu.memory_space<vmem>>, vector<1x4x512xf32>
    %94 = vector.shape_cast %93 : vector<1x4x512xf32> to vector<4x512xf32>
    %c0_94 = arith.constant 0 : index
    %c4 = arith.constant 4 : index
    %c128_95 = arith.constant 128 : index
    %95 = vector.load %arg1[%c0_94, %c4, %c128_95] : memref<1x8x768xf32, #tpu.memory_space<vmem>>, vector<1x4x512xf32>
    %96 = vector.shape_cast %95 : vector<1x4x512xf32> to vector<4x512xf32>
    %97 = vector.extract_strided_slice %92 {offsets = [0, 0], sizes = [1, 512], strides = [1, 1]} : vector<2x512xf32> to vector<1x512xf32>
    %98 = vector.broadcast %97 : vector<1x512xf32> to vector<4x512xf32>
    %99 = arith.mulf %94, %98 : vector<4x512xf32>
    %100 = vector.extract_strided_slice %92 {offsets = [1, 0], sizes = [1, 512], strides = [1, 1]} : vector<2x512xf32> to vector<1x512xf32>
    %101 = vector.broadcast %100 : vector<1x512xf32> to vector<4x512xf32>
    %102 = arith.mulf %96, %101 : vector<4x512xf32>
    %103 = arith.addf %99, %102 : vector<4x512xf32>
    %c0_96 = arith.constant 0 : index
    %c0_97 = arith.constant 0 : index
    %c0_98 = arith.constant 0 : index
    %104 = vector.load %arg6[%c0_96, %c0_97, %c0_98] : memref<1x6x512xf32, #tpu.memory_space<vmem>>, vector<1x4x512xf32>
    %105 = vector.shape_cast %104 : vector<1x4x512xf32> to vector<4x512xf32>
    %106 = vector.shape_cast %103 : vector<4x512xf32> to vector<1x4x512xf32>
    tpu.vector_store %arg6[%c0_96, %c0_97, %c0_98], %106 {strides = array<i32>} : memref<1x6x512xf32, #tpu.memory_space<vmem>>, vector<1x4x512xf32>,
    %c0_99 = arith.constant 0 : index
    %c4_100 = arith.constant 4 : index
    %c0_101 = arith.constant 0 : index
    %107 = vector.load %arg6[%c0_99, %c4_100, %c0_101] : memref<1x6x512xf32, #tpu.memory_space<vmem>>, vector<1x2x512xf32>
    %108 = vector.shape_cast %107 : vector<1x2x512xf32> to vector<2x512xf32>
    %109 = vector.shape_cast %92 : vector<2x512xf32> to vector<1x2x512xf32>
    tpu.vector_store %arg6[%c0_99, %c4_100, %c0_101], %109 {strides = array<i32>} : memref<1x6x512xf32, #tpu.memory_space<vmem>>, vector<1x2x512xf32>,
    return
  }
  func.func @transform_0(%arg0: i32) -> (i32, i32, i32) {
    %c0_i32 = arith.constant 0 : i32
    %c0_i32_0 = arith.constant 0 : i32
    %c0_i32_1 = arith.constant 0 : i32
    return %arg0, %c0_i32, %c0_i32_0 : i32, i32, i32
  }
  func.func @transform_1(%arg0: i32) -> (i32, i32) {
    %c0_i32 = arith.constant 0 : i32
    %c0_i32_0 = arith.constant 0 : i32
    %c0_i32_1 = arith.constant 0 : i32
    return %c0_i32, %c0_i32_0 : i32, i32
  }
  func.func @transform_2(%arg0: i32) -> (i32, i32) {
    %c0_i32 = arith.constant 0 : i32
    %c0_i32_0 = arith.constant 0 : i32
    %c0_i32_1 = arith.constant 0 : i32
    return %c0_i32, %c0_i32_0 : i32, i32
  }
  func.func @transform_3(%arg0: i32) -> (i32, i32) {
    %c0_i32 = arith.constant 0 : i32
    %c0_i32_0 = arith.constant 0 : i32
    %c0_i32_1 = arith.constant 0 : i32
    return %c0_i32, %c0_i32_0 : i32, i32
  }
  func.func @transform_4(%arg0: i32) -> (i32, i32) {
    %c0_i32 = arith.constant 0 : i32
    %c0_i32_0 = arith.constant 0 : i32
    %c0_i32_1 = arith.constant 0 : i32
    return %c0_i32, %c0_i32_0 : i32, i32
  }
  func.func @transform_5(%arg0: i32) -> (i32, i32, i32) {
    %c0_i32 = arith.constant 0 : i32
    %c0_i32_0 = arith.constant 0 : i32
    %c0_i32_1 = arith.constant 0 : i32
    return %arg0, %c0_i32, %c0_i32_0 : i32, i32, i32
  }
}

</mosaic_0001>

<bundles_post_ra>
// kernel: tpu_custom_call.1
= control target key start
LH: loop header
LB: loop body
LE: loop exit
PB: predicated region body
PF: predicated region fallthrough
CT: control target
= control target key end

     0   :  { %10 = vsyncpa [#allocation4], 0  ;;  %s2483_s0 = inlined_call_operand.hbm [shape: f32[2,8,768], index: 0, kind: input, shape index: {}]   ;;  %s2484_s1 = inlined_call_operand.vmem [shape: f32[8,200], index: 1, kind: input, shape index: {}]   ;;  %s2485_s2 = inlined_call_operand.vmem [shape: f32[8,1], index: 2, kind: input, shape index: {}]   ;;  %s2486_s3 = inlined_call_operand.vmem [shape: f32[2,8], index: 3, kind: input, shape index: {}]   ;;  %s2487_s4 = inlined_call_operand.vmem [shape: f32[2,1], index: 4, kind: input, shape index: {}]   ;;  %s2488_s5 = inlined_call_operand.vmem [shape: f32[2,6,512], index: 5, kind: output, shape index: {}]  }
   0x1   :  { %12 = vsyncpa [#allocation4 + $0x1], 0  ;;  %s2182_s18 = smov 0   ;;  %s2184_s19 = smov 0  }
   0x2   :  { %s2186_s20 = smov 0   ;;  %s2188_s21 = smov 0  }
   0x3 LB: > { %s2201_s22 = sadd.s32 4294967295, %s2123_s21   ;;  %s2204_s23 = sadd.s32 1, %s2123_s21   ;;  %s2123_s21 = sphi %s2188_s21, %s2495_s21   ;;  %s2119_s20 = sphi %s2186_s20, %s2494_s20   ;;  %s2115_s19 = sphi %s2184_s19, %s2493_s19   ;;  %s2111_s18 = sphi %s2182_s18, %s2492_s18  }
   0x4   : > { %s22_s24 = ssub.s32 %s2123_s21, %s2204_s23  ;;  %s25_s25 = sadd.s32 1, %s2119_s20 }
   0x5   : > { %p23_p0 = scmp.eq.s32.totalorder %s22_s24, 0  ;;  %p32_p1 = scmp.ne.s32.totalorder %s2119_s20, %s2115_s19 }
   0x6   : > { %p33_p2 = scmp.eq.s32.totalorder %s2123_s21, 0  ;;  %p38_p3 = scmp.ne.s32.totalorder %s2115_s19, %s2111_s18 }
   0x7   : > { %s2214_s26 = scalar_select %p23_p0, %s2119_s20, %s25_s25  }
   0x8   : > { %p34_p4 = por %p33_p2, %p32_p1  ;;  %p39_p5 = scmp.eq.s32.totalorder %s2201_s22, 0 }
   0x9   : > { %p1752_p6 = scmp.lt.s32.totalorder %s2123_s21, 2  ;;  %s184_s28 = sand.u32 1, %s2119_s20  }
   0xa   : > { %p2218_p7 = por %p39_p5, %p38_p3  ;;  %s1743_s29 = smul.u32 48, %s184_s28 }
   0xb   : > { %s1744_s30 = smul.u32 768, %s2123_s21  ;;  %p2224_p8 = pnand %p1752_p6, %p34_p4 }
   0xc   : > { %s188_s10 = scalar_lea.vmem [#allocation3], %s1743_s29  ;;  %s185_s12 = scalar_lea.sflag [#allocation4], %s184_s28 }
   0xd   : > { %s2232_s9 = scalar_lea.hbm %s2483_s0, %s1744_s30  ;;  %s196_s11 = sshll.u32 %s188_s10, 4  ;;  %s2234_s11 = int_to_ptr.vmem [resolvable:$true] %s196_s11 }
   0xe   : > { %s2059_s13 = scalar_lea.hbm %s2232_s9, 768  ;;  %p2061_p11 = pneg %p2224_p8 }
   0xf   : > { %p2060_p10 = scmp.ne.s32.totalorder %s2232_s9, %s2059_s13  ;;  %s2064_s16 = scalar_lea.hbm %s2483_s0, 1536 }
  0x10   : > { %p2065_p0 = scmp.lt.u32.totalorder %s2232_s9, %s2483_s0  ;;  %p2066_p1 = scmp.lt.u32.totalorder %s2064_s16, %s2059_s13 }
  0x11   : > { %p2062_p12 = pnand %p2061_p11, %p2060_p10  ;;  %p2068_p3 = scmp.lt.u32.totalorder %s2059_s13, %s2232_s9 }
  0x12   : > { %p2067_p2 = por %p2066_p1, %p2065_p0 }
  0x13   : > { %p2063_p13 = pneg %p2062_p12 }
  0x14   : > { %p2069_p4 = por %p2068_p3, %p2067_p2 }
  0x16   : > { %p2070_p5 = pnand %p2069_p4, %p2063_p13 }
  0x18   : > { %2073 = shalt.err (!%p2070_p5)
}
  0x19   : > { %s2074_s24 = scalar_lea.vmem %s2234_s11, 768  ;;  %s2125_s25 = smov [#allocation3]  }
  0x1a   : > { %p2075_p6 = scmp.ne.s32.totalorder %s2234_s11, %s2074_s24  ;;  %s2079_s28 = sshll.u32 %s2125_s25, 4  ;;  %s2080_s28 = int_to_ptr.vmem [resolvable:$false] %s2079_s28 }
  0x1b   : > { %s2081_s29 = scalar_lea.vmem %s2080_s28, 1536  ;;  %p2082_p9 = scmp.lt.s32.totalorder %s2234_s11, %s2080_s28 }
  0x1c   : > { %p2077_p10 = pnand %p2075_p6, %p2061_p11  ;;  %p2083_p0 = scmp.lt.s32.totalorder %s2081_s29, %s2074_s24 }
  0x1e   : > { %p2078_p12 = pneg %p2077_p10  ;;  %p2084_p1 = por %p2083_p0, %p2082_p9 }
  0x20   : > { %p2085_p2 = pnand %p2084_p1, %p2078_p12 }
  0x22   : > { %2088 = shalt.err (!%p2085_p2)
}
  0x23   : > { %1751 = dma.hbm_to_vmem [thread:$0]  (!%p2224_p8), %s2232_s9, 768, %s2234_s11, %s185_s12  }
  0x24   : > { %p201_p13 = scmp.lt.s32.totalorder %s2123_s21, 3  ;;  %p2491_p3 = scmp.ge.s32.totalorder %s2123_s21, 1 }
  0x26   : > { %p202_p11 = pnand %p2491_p3, %p201_p13 }
  0x27   : > { %s207_s30 = sand.u32 (!%p202_p11), 1, %s2115_s19  }
  0x28   : > { %205 = sbr.rel (%p202_p11) target bundleno = 783 (0x30f), region = 40  ;;  %s208_s8 = scalar_lea.sflag (!%p202_p11), [#allocation4], %s207_s30 }
  0x29   : > { %s1745_s7 = smul.u32 (!%p202_p11), 48, %s207_s30 }
  0x2b   : > { %s2265_s10 = scalar_lea.vmem (!%p202_p11), [#allocation3], %s1745_s7 }
  0x2f   : > { %2106 = dma.done.wait (%p2218_p7), %s208_s8, 768  }
  0x30   : > { %2108 = vsyncadd (%p2218_p7), %s208_s8, 4294966528  ;;  %v2272_v0 = vld [vmem:[%s2265_s10 + $0x8] sm:$0xff]  ;;  %v2275_v1 = vld [vmem:[%s2265_s10 + $0x10] sm:$0xff]  ;;  %s2126_s21 = smov 41   ;;  %s2127_s27 = smov 42   ;;  %vm263_vm0 = vcmask 343040  }
  0x31   : > { %v2278_v2 = vld [vmem:[%s2265_s10 + $0x18] sm:$0xff]  ;;  %v1821_v3 = vpack.i.bf16 %v2275_v1, %v2272_v0  ;;  %v2283_v4 = vld [vmem:[%s2265_s10 + $0x20] sm:$0xff]  ;;  %s2128_s6 = smov 40   ;;  %s2129_s9 = smov 39   ;;  %v2289_v7 = vld [vmem:[%s2265_s10 + $0x28] sm:$0xff]  ;;  %vm296_vm1 = vcmask 334848  }
  0x32   : > { %v1826_v5 = vpack.i.bf16 %v2283_v4, %v2278_v2  ;;  %v276_v6 = vld [vmem:[%s2265_s10] sm:$0xff]  ;;  %s2130_s11 = smov 38   ;;  %s2131_s12 = smov 22   ;;  %v2293_v8 = vpack.i.bf16 %v2289_v7, %v2283_v4  ;;  %v2297_v9 = vpack.i.bf16 %v2278_v2, %v2275_v1  ;;  %vm329_vm2 = vcmask 326656   ;;  %v1044_v51 = vld [vmem:[%s2484_s1 + $0x8] sm:$0xff] }
  0x33   : > { %1822 = vrot.lane.b32.xlu1 %v1821_v3, %s2126_s21  ;;  %1812 = vrot.lane.b32.xlu0 %v1821_v3, %s2127_s27  ;;  %s2132_s13 = smov 21   ;;  %s2133_s14 = smov 20   ;;  %vm362_vm3 = vcmask 318464   ;;  %vm1151_vm4 = vcmask 588800   ;;  %vm395_vm5 = vcmask 310272   ;;  %vm428_vm6 = vcmask 179200  }
  0x34   : > { %s2134_s15 = smov 19   ;;  %s2135_s16 = smov 18   ;;  %1636 = vmatprep.mubr.msk.f32.mxu0 %vm1151_vm4, %v1044_v51  ;;  %1637 = vmatprep.mubr.msk.f32.mxu1 %vm1151_vm4, %v1044_v51  ;;  %vm461_vm7 = vcmask 171008   ;;  %vm494_vm8 = vcmask 162816   ;;  %vm527_vm9 = vcmask 154624   ;;  %vm560_vm10 = vcmask 146432  }
  0x35   : > { %s2136_s17 = smov 2   ;;  %s2137_s18 = smov 1   ;;  %vm593_vm11 = vcmask 15360   ;;  %vm626_vm12 = vcmask 7168   ;;  %vm667_vm13 = vcmask 1039360   ;;  %vm700_vm14 = vcmask 1031168  }
  0x36   : > { %s2138_s24 = smov 127   ;;  %s2139_s25 = smov 126   ;;  %vm733_vm15 = vcmask 900096   ;;  %vm898_vm4 = vcmask 736256  }
  0x37   : > { %1827 = vrot.lane.b32.xlu1 %v1826_v5, %s2126_s21  ;;  %1817 = vrot.lane.b32.xlu0 %v1826_v5, %s2127_s27  ;;  %s2140_s28 = smov 110   ;;  %s2141_s29 = smov 109  }
  0x38   : > { %s2142_s30 = smov 108   ;;  %s2143_s7 = smov 107  }
  0x39   : > { %s2144_s8 = smov 106   ;;  %p238_p7 = scmp.lt.s32.totalorder %s2201_s22, 1 }
  0x3b   : > { %286 = vrot.lane.b32.xlu1 %v276_v6, %s2126_s21  ;;  %253 = vrot.lane.b32.xlu0 %v276_v6, %s2127_s27  ;;  %s2145_s21 = smov 90   ;;  %s2146_s27 = smov 89  }
  0x3c   : > { %s2497_s22 = smov (!%p238_p7, %s2201_s22), 1 }
  0x3f   : > { %1837 = vrot.lane.b32.xlu1 %v1826_v5, %s2128_s6  ;;  %1832 = vrot.lane.b32.xlu0 %v1821_v3, %s2128_s6 }
  0x43   : > { %1847 = vrot.lane.b32.xlu1 %v1826_v5, %s2129_s9  ;;  %1842 = vrot.lane.b32.xlu0 %v1821_v3, %s2129_s9 }
  0x47   : > { %352 = vrot.lane.b32.xlu1 %v276_v6, %s2129_s9  ;;  %319 = vrot.lane.b32.xlu0 %v276_v6, %s2128_s6  ;;  %s2147_s6 = smov 88   ;;  %s2148_s9 = smov 87  }
  0x4b   : > { %1857 = vrot.lane.b32.xlu1 %v1826_v5, %s2130_s11  ;;  %1852 = vrot.lane.b32.xlu0 %v1821_v3, %s2130_s11 }
  0x4f   : > { %1867 = vrot.lane.b32.xlu1 %v1826_v5, %s2131_s12  ;;  %1862 = vrot.lane.b32.xlu0 %v1821_v3, %s2131_s12 }
  0x53   : > { %418 = vrot.lane.b32.xlu1 %v276_v6, %s2131_s12  ;;  %385 = vrot.lane.b32.xlu0 %v276_v6, %s2130_s11 }
  0x57   : > { %1877 = vrot.lane.b32.xlu1 %v1826_v5, %s2132_s13  ;;  %1872 = vrot.lane.b32.xlu0 %v1821_v3, %s2132_s13 }
  0x5b   : > { %1887 = vrot.lane.b32.xlu1 %v1826_v5, %s2133_s14  ;;  %1882 = vrot.lane.b32.xlu0 %v1821_v3, %s2133_s14 }
  0x5f   : > { %484 = vrot.lane.b32.xlu1 %v276_v6, %s2133_s14  ;;  %451 = vrot.lane.b32.xlu0 %v276_v6, %s2132_s13  ;;  %s2149_s13 = smov 86  }
  0x63   : > { %1897 = vrot.lane.b32.xlu1 %v1826_v5, %s2134_s15  ;;  %1892 = vrot.lane.b32.xlu0 %v1821_v3, %s2134_s15 }
  0x67   : > { %1907 = vrot.lane.b32.xlu1 %v1826_v5, %s2135_s16  ;;  %1902 = vrot.lane.b32.xlu0 %v1821_v3, %s2135_s16 }
  0x6b   : > { %550 = vrot.lane.b32.xlu1 %v276_v6, %s2135_s16  ;;  %517 = vrot.lane.b32.xlu0 %v276_v6, %s2134_s15 }
  0x6f   : > { %1917 = vrot.lane.b32.xlu1 %v1826_v5, %s2136_s17  ;;  %1912 = vrot.lane.b32.xlu0 %v1821_v3, %s2136_s17 }
  0x73   : > { %1927 = vrot.lane.b32.xlu1 %v1826_v5, %s2137_s18  ;;  %1922 = vrot.lane.b32.xlu0 %v1821_v3, %s2137_s18  ;;  %v2150_v5 = vmov 0  }
  0x74   : > { %2041 = vset.pattern.permute.xlu0 %v2150_v5  ;;  %2042 = vset.pattern.permute.xlu1 %v2150_v5 }
  0x77   : > { %616 = vrot.lane.b32.xlu1 %v276_v6, %s2137_s18  ;;  %583 = vrot.lane.b32.xlu0 %v276_v6, %s2136_s17 }
  0x7b   : > { %1937 = vrot.lane.b32.xlu1 %v2293_v8, %s2138_s24  ;;  %1932 = vrot.lane.b32.xlu0 %v2297_v9, %s2138_s24 }
  0x7f   : > { %1942 = vrot.lane.b32.xlu1 %v2297_v9, %s2139_s25  ;;  %657 = vrot.lane.b32.xlu0 %v2272_v0, %s2138_s24 }
  0x83   : > { %1952 = vrot.lane.b32.xlu1 %v2297_v9, %s2140_s28  ;;  %1947 = vrot.lane.b32.xlu0 %v2293_v8, %s2139_s25 }
  0x87   : > { %690 = vrot.lane.b32.xlu1 %v2272_v0, %s2139_s25  ;;  %1957 = vrot.lane.b32.xlu0 %v2293_v8, %s2140_s28 }
  0x8b   : > { %1962 = vrot.lane.b32.xlu1 %v2297_v9, %s2141_s29  ;;  %723 = vrot.lane.b32.xlu0 %v2272_v0, %s2140_s28 }
  0x8f   : > { %1972 = vrot.lane.b32.xlu1 %v2297_v9, %s2142_s30  ;;  %1967 = vrot.lane.b32.xlu0 %v2293_v8, %s2141_s29 }
  0x93   : > { %756 = vrot.lane.b32.xlu1 %v2272_v0, %s2141_s29  ;;  %1977 = vrot.lane.b32.xlu0 %v2293_v8, %s2142_s30  ;;  %s1646_s29 = sshll.u32 %s2497_s22, 5 }
  0x97   : > { %1982 = vrot.lane.b32.xlu1 %v2297_v9, %s2143_s7  ;;  %789 = vrot.lane.b32.xlu0 %v2272_v0, %s2142_s30 }
  0x9b   : > { %1992 = vrot.lane.b32.xlu1 %v2297_v9, %s2144_s8  ;;  %1987 = vrot.lane.b32.xlu0 %v2293_v8, %s2143_s7 }
  0x9f   : > { %822 = vrot.lane.b32.xlu1 %v2272_v0, %s2143_s7  ;;  %1997 = vrot.lane.b32.xlu0 %v2293_v8, %s2144_s8 }
  0xa3   : > { %2002 = vrot.lane.b32.xlu1 %v2297_v9, %s2145_s21  ;;  %855 = vrot.lane.b32.xlu0 %v2272_v0, %s2144_s8  ;;  %s2452_s8 = scalar_lea.vmem %s2488_s5, %s1646_s29 }
  0xa5   : > { %v1823_v10 = vpop.permute.xlu1 %1822  ;;  %v1813_v11 = vpop.permute.xlu0 %1812 }
  0xa6   : > { %v1825_v12 = vunpack.i.h.bf16 %v1823_v10  ;;  %v1824_v13 = vunpack.i.l.bf16 %v1823_v10  ;;  %v1815_v14 = vunpack.i.h.bf16 %v1813_v11  ;;  %v1814_v15 = vunpack.i.l.bf16 %v1813_v11 }
  0xa7   : > { %2012 = vrot.lane.b32.xlu1 %v2297_v9, %s2146_s27  ;;  %2007 = vrot.lane.b32.xlu0 %v2293_v8, %s2145_s21 }
  0xa8   : > { %v265_v16 = vsel %vm263_vm0, %v1814_v15, %v1815_v14  ;;  %v298_v17 = vsel %vm296_vm1, %v1824_v13, %v1825_v12 }
  0xa9   : > { %v1828_v18 = vpop.permute.xlu1 %1827  ;;  %v1818_v19 = vpop.permute.xlu0 %1817  ;;  %v1647_v20 = vpack.c.bf16 %v298_v17, %v265_v16 }
  0xaa   : > { %v1830_v21 = vunpack.i.h.bf16 %v1828_v18  ;;  %v1829_v22 = vunpack.i.l.bf16 %v1828_v18  ;;  %v1820_v23 = vunpack.i.h.bf16 %v1818_v19  ;;  %v1819_v24 = vunpack.i.l.bf16 %v1818_v19 }
  0xab   : > { %888 = vrot.lane.b32.xlu1 %v2272_v0, %s2145_s21  ;;  %1648 = vmatprep.subr.bf16.mxu0 %v1647_v20 }
  0xac   : > { %2017 = vrot.lane.b32.xlu0 %v2293_v8, %s2146_s27  ;;  %v267_v25 = vsel %vm263_vm0, %v1819_v24, %v1820_v23  ;;  %v300_v26 = vsel %vm296_vm1, %v1829_v22, %v1830_v21  ;;  %v266_v27 = vsel %vm263_vm0, %v1815_v14, %v1819_v24  ;;  %v299_v28 = vsel %vm296_vm1, %v1825_v12, %v1829_v22 }
  0xad   : > { %v287_v29 = vpop.permute.xlu1 %286  ;;  %v254_v30 = vpop.permute.xlu0 %253  ;;  %v1695_v31 = vpack.c.bf16 %v300_v26, %v267_v25  ;;  %v1697_v32 = vpack.c.bf16 %v299_v28, %v266_v27  ;;  %v1145_v28 = vld [vmem:[%s2485_s2] sm:$0xff] }
  0xae   : > { %v297_v33 = vsel %vm296_vm1, %v287_v29, %v1824_v13  ;;  %v264_v34 = vsel %vm263_vm0, %v254_v30, %v1814_v15  ;;  %vm766_vm0 = vcmask 891904   ;;  %vm799_vm1 = vcmask 883712  }
  0xaf   : > { %2022 = vrot.lane.b32.xlu1 %v2297_v9, %s2147_s6  ;;  %1696 = vmatprep.subr.bf16.mxu1 %v1695_v31  ;;  %v1649_v35 = vpack.c.bf16 %v297_v33, %v264_v34 }
  0xb0   : > { %921 = vrot.lane.b32.xlu0 %v2272_v0, %s2146_s27  ;;  %1698 = vmatpush1.bf16.msra.mxu1 %v1697_v32 }
  0xb1   : > { %v1838_v36 = vpop.permute.xlu1 %1837  ;;  %1650 = vmatpush1.bf16.msra.mxu0 %v1649_v35  ;;  %v1833_v37 = vpop.permute.xlu0 %1832 }
  0xb2   : > { %v1840_v38 = vunpack.i.h.bf16 %v1838_v36  ;;  %v1839_v39 = vunpack.i.l.bf16 %v1838_v36  ;;  %v1835_v40 = vunpack.i.h.bf16 %v1833_v37  ;;  %v1834_v41 = vunpack.i.l.bf16 %v1833_v37 }
  0xb3   : > { %2032 = vrot.lane.b32.xlu1 %v2297_v9, %s2148_s9 }
  0xb4   : > { %2027 = vrot.lane.b32.xlu0 %v2293_v8, %s2147_s6  ;;  %v333_v48 = vsel %vm329_vm2, %v1839_v39, %v1840_v38  ;;  %v331_v49 = vsel %vm329_vm2, %v1834_v41, %v1835_v40  ;;  %v332_v50 = vsel %vm329_vm2, %v1835_v40, %v1839_v39 }
  0xb5   : > { %v1848_v42 = vpop.permute.xlu1 %1847  ;;  %v1843_v43 = vpop.permute.xlu0 %1842 }
  0xb6   : > { %v1850_v44 = vunpack.i.h.bf16 %v1848_v42  ;;  %v1849_v45 = vunpack.i.l.bf16 %v1848_v42  ;;  %v1845_v46 = vunpack.i.h.bf16 %v1843_v43  ;;  %v1844_v47 = vunpack.i.l.bf16 %v1843_v43 }
  0xb7   : > { %954 = vrot.lane.b32.xlu1 %v2272_v0, %s2147_s6 }
  0xb8   : > { %2037 = vrot.lane.b32.xlu0 %v2293_v8, %s2148_s9  ;;  %v366_v52 = vsel %vm362_vm3, %v1849_v45, %v1850_v44  ;;  %v364_v53 = vsel %vm362_vm3, %v1844_v47, %v1845_v46  ;;  %v365_v54 = vsel %vm362_vm3, %v1845_v46, %v1849_v45 }
  0xb9   : > { %v353_v55 = vpop.permute.xlu1 %352  ;;  %v320_v56 = vpop.permute.xlu0 %319  ;;  %v1699_v57 = vpack.c.bf16 %v366_v52, %v333_v48  ;;  %v1651_v58 = vpack.c.bf16 %v364_v53, %v331_v49  ;;  %v1701_v59 = vpack.c.bf16 %v365_v54, %v332_v50 }
  0xba   : > { %v363_v60 = vsel %vm362_vm3, %v353_v55, %v1844_v47  ;;  %v330_v61 = vsel %vm329_vm2, %v320_v56, %v1834_v41  ;;  %vm832_vm2 = vcmask 875520   ;;  %vm865_vm3 = vcmask 867328  }
  0xbb   : > { %v1653_v62 = vpack.c.bf16 %v363_v60, %v330_v61  ;;  %1022 = vrot.lane.b32.xlu1 %v2275_v1, %s2149_s13  ;;  %1700 = vmatprep.subr.bf16.mxu1 %v1699_v57 }
  0xbc   : > { %987 = vrot.lane.b32.xlu0 %v2272_v0, %s2148_s9  ;;  %1652 = vmatprep.subr.bf16.mxu0 %v1651_v58 }
  0xbd   : > { %1702 = vmatpush1.bf16.msra.mxu1 %v1701_v59  ;;  %v1858_v63 = vpop.permute.xlu1 %1857  ;;  %v1853_v3 = vpop.permute.xlu0 %1852  ;;  %1654 = vmatpush1.bf16.msra.mxu0 %v1653_v62 }
  0xbe   : > { %v1860_v6 = vunpack.i.h.bf16 %v1858_v63  ;;  %v1859_v8 = vunpack.i.l.bf16 %v1858_v63  ;;  %v1855_v9 = vunpack.i.h.bf16 %v1853_v3  ;;  %v1854_v10 = vunpack.i.l.bf16 %v1853_v3 }
  0xbf   : > { %1026 = vrot.lane.b32.xlu1 %v2283_v4, %s2149_s13 }
  0xc0   : > { %1024 = vrot.lane.b32.xlu0 %v2278_v2, %s2149_s13  ;;  %v397_v17 = vsel %vm395_vm5, %v1854_v10, %v1855_v9  ;;  %v399_v18 = vsel %vm395_vm5, %v1859_v8, %v1860_v6  ;;  %v398_v21 = vsel %vm395_vm5, %v1855_v9, %v1859_v8 }
  0xc1   : > { %v1868_v11 = vpop.permute.xlu1 %1867  ;;  %v1863_v12 = vpop.permute.xlu0 %1862 }
  0xc2   : > { %v1870_v13 = vunpack.i.h.bf16 %v1868_v11  ;;  %v1869_v14 = vunpack.i.l.bf16 %v1868_v11  ;;  %v1865_v15 = vunpack.i.h.bf16 %v1863_v12  ;;  %v1864_v16 = vunpack.i.l.bf16 %v1863_v12 }
  0xc3   : > { %1020 = vrot.lane.b32.xlu1 %v2272_v0, %s2149_s13 }
  0xc4   : > { %1028 = vrot.lane.b32.xlu0 %v2289_v7, %s2149_s13  ;;  %v430_v19 = vsel %vm428_vm6, %v1864_v16, %v1865_v15  ;;  %v432_v20 = vsel %vm428_vm6, %v1869_v14, %v1870_v13  ;;  %v431_v22 = vsel %vm428_vm6, %v1865_v15, %v1869_v14 }
  0xc5   : > { %v419_v23 = vpop.permute.xlu1 %418  ;;  %v386_v24 = vpop.permute.xlu0 %385  ;;  %v1655_v25 = vpack.c.bf16 %v430_v19, %v397_v17  ;;  %v1703_v26 = vpack.c.bf16 %v432_v20, %v399_v18  ;;  %v1705_v27 = vpack.c.bf16 %v431_v22, %v398_v21 }
  0xc6   : > { %v429_v29 = vsel %vm428_vm6, %v419_v23, %v1864_v16  ;;  %v396_v7 = vsel %vm395_vm5, %v386_v24, %v1854_v10  ;;  %vm931_vm5 = vcmask 728064   ;;  %vm964_vm6 = vcmask 719872  }
  0xc7   : > { %v1657_v30 = vpack.c.bf16 %v429_v29, %v396_v7  ;;  %1656 = vmatprep.subr.bf16.mxu0 %v1655_v25  ;;  %1704 = vmatprep.subr.bf16.mxu1 %v1703_v26 }
  0xc8   : > { %1706 = vmatpush1.bf16.msra.mxu1 %v1705_v27  ;;  %1148 = vperm.xlu0 %2041, %v1145_v28  }
  0xc9   : > { %v1878_v31 = vpop.permute.xlu1 %1877  ;;  %v1873_v32 = vpop.permute.xlu0 %1872  ;;  %1658 = vmatpush1.bf16.msra.mxu0 %v1657_v30 }
  0xca   : > { %v1880_v33 = vunpack.i.h.bf16 %v1878_v31  ;;  %v1879_v34 = vunpack.i.l.bf16 %v1878_v31  ;;  %v1875_v35 = vunpack.i.h.bf16 %v1873_v32  ;;  %v1874_v36 = vunpack.i.l.bf16 %v1873_v32 }
  0xcc   : > { %v463_v43 = vsel %vm461_vm7, %v1874_v36, %v1875_v35  ;;  %v465_v44 = vsel %vm461_vm7, %v1879_v34, %v1880_v33  ;;  %v464_v47 = vsel %vm461_vm7, %v1875_v35, %v1879_v34 }
  0xcd   : > { %v1888_v37 = vpop.permute.xlu1 %1887  ;;  %v1883_v38 = vpop.permute.xlu0 %1882 }
  0xce   : > { %v1890_v39 = vunpack.i.h.bf16 %v1888_v37  ;;  %v1889_v40 = vunpack.i.l.bf16 %v1888_v37  ;;  %v1885_v41 = vunpack.i.h.bf16 %v1883_v38  ;;  %v1884_v42 = vunpack.i.l.bf16 %v1883_v38 }
  0xd0   : > { %v496_v45 = vsel %vm494_vm8, %v1884_v42, %v1885_v41  ;;  %v498_v46 = vsel %vm494_vm8, %v1889_v40, %v1890_v39  ;;  %v497_v48 = vsel %vm494_vm8, %v1885_v41, %v1889_v40 }
  0xd1   : > { %v485_v49 = vpop.permute.xlu1 %484  ;;  %v452_v50 = vpop.permute.xlu0 %451  ;;  %v1659_v51 = vpack.c.bf16 %v496_v45, %v463_v43  ;;  %v1707_v52 = vpack.c.bf16 %v498_v46, %v465_v44  ;;  %v1709_v53 = vpack.c.bf16 %v497_v48, %v464_v47 }
  0xd2   : > { %v495_v54 = vsel %vm494_vm8, %v485_v49, %v1884_v42  ;;  %v462_v55 = vsel %vm461_vm7, %v452_v50, %v1874_v36  ;;  %vm997_vm7 = vcmask 711680   ;;  %vm1030_vm8 = vcmask 703488  }
  0xd3   : > { %v1661_v56 = vpack.c.bf16 %v495_v54, %v462_v55  ;;  %1660 = vmatprep.subr.bf16.mxu0 %v1659_v51  ;;  %1708 = vmatprep.subr.bf16.mxu1 %v1707_v52 }
  0xd4   : > { %1710 = vmatpush1.bf16.msra.mxu1 %v1709_v53 }
  0xd5   : > { %v1898_v57 = vpop.permute.xlu1 %1897  ;;  %v1893_v58 = vpop.permute.xlu0 %1892  ;;  %1662 = vmatpush1.bf16.msra.mxu0 %v1661_v56 }
  0xd6   : > { %v1900_v59 = vunpack.i.h.bf16 %v1898_v57  ;;  %v1899_v60 = vunpack.i.l.bf16 %v1898_v57  ;;  %v1895_v61 = vunpack.i.h.bf16 %v1893_v58  ;;  %v1894_v62 = vunpack.i.l.bf16 %v1893_v58 }
  0xd8   : > { %v529_v10 = vsel %vm527_vm9, %v1894_v62, %v1895_v61  ;;  %v531_v11 = vsel %vm527_vm9, %v1899_v60, %v1900_v59  ;;  %v530_v14 = vsel %vm527_vm9, %v1895_v61, %v1899_v60 }
  0xd9   : > { %v1908_v63 = vpop.permute.xlu1 %1907  ;;  %v1903_v3 = vpop.permute.xlu0 %1902 }
  0xda   : > { %v1910_v5 = vunpack.i.h.bf16 %v1908_v63  ;;  %v1909_v6 = vunpack.i.l.bf16 %v1908_v63  ;;  %v1905_v8 = vunpack.i.h.bf16 %v1903_v3  ;;  %v1904_v9 = vunpack.i.l.bf16 %v1903_v3 }
  0xdc   : > { %v562_v12 = vsel %vm560_vm10, %v1904_v9, %v1905_v8  ;;  %v564_v13 = vsel %vm560_vm10, %v1909_v6, %v1910_v5  ;;  %v563_v15 = vsel %vm560_vm10, %v1905_v8, %v1909_v6 }
  0xdd   : > { %v551_v16 = vpop.permute.xlu1 %550  ;;  %v518_v17 = vpop.permute.xlu0 %517  ;;  %v1663_v18 = vpack.c.bf16 %v562_v12, %v529_v10  ;;  %v1711_v19 = vpack.c.bf16 %v564_v13, %v531_v11  ;;  %v1713_v20 = vpack.c.bf16 %v563_v15, %v530_v14 }
  0xde   : > { %v561_v21 = vsel %vm560_vm10, %v551_v16, %v1904_v9  ;;  %v528_v22 = vsel %vm527_vm9, %v518_v17, %v1894_v62  ;;  %vm1308_vm9 = vcmask 64512  }
  0xdf   : > { %v1665_v23 = vpack.c.bf16 %v561_v21, %v528_v22  ;;  %1664 = vmatprep.subr.bf16.mxu0 %v1663_v18  ;;  %1712 = vmatprep.subr.bf16.mxu1 %v1711_v19 }
  0xe0   : > { %1714 = vmatpush1.bf16.msra.mxu1 %v1713_v20 }
  0xe1   : > { %v1918_v24 = vpop.permute.xlu1 %1917  ;;  %v1913_v25 = vpop.permute.xlu0 %1912  ;;  %1666 = vmatpush1.bf16.msra.mxu0 %v1665_v23 }
  0xe2   : > { %v1920_v26 = vunpack.i.h.bf16 %v1918_v24  ;;  %v1919_v27 = vunpack.i.l.bf16 %v1918_v24  ;;  %v1915_v28 = vunpack.i.h.bf16 %v1913_v25  ;;  %v1914_v29 = vunpack.i.l.bf16 %v1913_v25 }
  0xe4   : > { %v595_v35 = vsel %vm593_vm11, %v1914_v29, %v1915_v28  ;;  %v597_v36 = vsel %vm593_vm11, %v1919_v27, %v1920_v26  ;;  %v596_v39 = vsel %vm593_vm11, %v1915_v28, %v1919_v27 }
  0xe5   : > { %v1928_v7 = vpop.permute.xlu1 %1927  ;;  %v1923_v30 = vpop.permute.xlu0 %1922 }
  0xe6   : > { %v1930_v31 = vunpack.i.h.bf16 %v1928_v7  ;;  %v1929_v32 = vunpack.i.l.bf16 %v1928_v7  ;;  %v1925_v33 = vunpack.i.h.bf16 %v1923_v30  ;;  %v1924_v34 = vunpack.i.l.bf16 %v1923_v30 }
  0xe8   : > { %v628_v37 = vsel %vm626_vm12, %v1924_v34, %v1925_v33  ;;  %v630_v38 = vsel %vm626_vm12, %v1929_v32, %v1930_v31  ;;  %v629_v40 = vsel %vm626_vm12, %v1925_v33, %v1929_v32 }
  0xe9   : > { %v617_v41 = vpop.permute.xlu1 %616  ;;  %v584_v42 = vpop.permute.xlu0 %583  ;;  %v1667_v43 = vpack.c.bf16 %v628_v37, %v595_v35  ;;  %v1715_v44 = vpack.c.bf16 %v630_v38, %v597_v36  ;;  %v1717_v45 = vpack.c.bf16 %v629_v40, %v596_v39 }
  0xea   : > { %v627_v46 = vsel %vm626_vm12, %v617_v41, %v1924_v34  ;;  %v594_v47 = vsel %vm593_vm11, %v584_v42, %v1914_v29 }
  0xeb   : > { %v1669_v48 = vpack.c.bf16 %v627_v46, %v594_v47  ;;  %1668 = vmatprep.subr.bf16.mxu0 %v1667_v43  ;;  %1716 = vmatprep.subr.bf16.mxu1 %v1715_v44 }
  0xec   : > { %1718 = vmatpush1.bf16.msra.mxu1 %v1717_v45 }
  0xed   : > { %v1938_v49 = vpop.permute.xlu1 %1937  ;;  %v1933_v50 = vpop.permute.xlu0 %1932  ;;  %1670 = vmatpush1.bf16.msra.mxu0 %v1669_v48 }
  0xee   : > { %v1940_v51 = vunpack.i.h.bf16 %v1938_v49  ;;  %v1939_v52 = vunpack.i.l.bf16 %v1938_v49  ;;  %v1935_v53 = vunpack.i.h.bf16 %v1933_v50  ;;  %v1934_v54 = vunpack.i.l.bf16 %v1933_v50 }
  0xf0   : > { %v669_v55 = vsel %vm667_vm13, %v1934_v54, %v1935_v53  ;;  %v671_v56 = vsel %vm667_vm13, %v1939_v52, %v1940_v51  ;;  %v670_v57 = vsel %vm667_vm13, %v1935_v53, %v1939_v52 }
  0xf1   : > { %v1943_v58 = vpop.permute.xlu1 %1942  ;;  %v658_v59 = vpop.permute.xlu0 %657  ;;  %v1671_v60 = vpack.c.bf16 %v669_v55, %v2275_v1  ;;  %v1719_v61 = vpack.c.bf16 %v671_v56, %v2283_v4  ;;  %v1721_v62 = vpack.c.bf16 %v670_v57, %v2278_v2 }
  0xf2   : > { %v668_v63 = vsel %vm667_vm13, %v658_v59, %v1934_v54  ;;  %v1945_v5 = vunpack.i.h.bf16 %v1943_v58  ;;  %v1944_v6 = vunpack.i.l.bf16 %v1943_v58 }
  0xf3   : > { %v1673_v3 = vpack.c.bf16 %v668_v63, %v2272_v0  ;;  %1672 = vmatprep.subr.bf16.mxu0 %v1671_v60  ;;  %1720 = vmatprep.subr.bf16.mxu1 %v1719_v61 }
  0xf4   : > { %1722 = vmatpush1.bf16.msra.mxu1 %v1721_v62  ;;  %v702_v4 = vsel %vm700_vm14, %v1944_v6, %v1945_v5 }
  0xf5   : > { %v1953_v8 = vpop.permute.xlu1 %1952  ;;  %v1948_v9 = vpop.permute.xlu0 %1947  ;;  %1674 = vmatpush1.bf16.msra.mxu0 %v1673_v3 }
  0xf6   : > { %v1955_v10 = vunpack.i.h.bf16 %v1953_v8  ;;  %v1954_v11 = vunpack.i.l.bf16 %v1953_v8  ;;  %v1950_v1 = vunpack.i.h.bf16 %v1948_v9  ;;  %v1949_v12 = vunpack.i.l.bf16 %v1948_v9 }
  0xf8   : > { %v735_v2 = vsel %vm733_vm15, %v1954_v11, %v1955_v10  ;;  %v704_v17 = vsel %vm700_vm14, %v1949_v12, %v1950_v1  ;;  %v703_v19 = vsel %vm700_vm14, %v1945_v5, %v1949_v12 }
  0xf9   : > { %v691_v13 = vpop.permute.xlu1 %690  ;;  %v1958_v0 = vpop.permute.xlu0 %1957  ;;  %v1675_v14 = vpack.c.bf16 %v735_v2, %v702_v4 }
  0xfa   : > { %v1960_v15 = vunpack.i.h.bf16 %v1958_v0  ;;  %v1959_v16 = vunpack.i.l.bf16 %v1958_v0  ;;  %v701_v25 = vsel %vm700_vm14, %v691_v13, %v1944_v6 }
  0xfb   : > { %1676 = vmatprep.subr.bf16.mxu0 %v1675_v14 }
  0xfc   : > { %v737_v18 = vsel %vm733_vm15, %v1959_v16, %v1960_v15  ;;  %v736_v20 = vsel %vm733_vm15, %v1955_v10, %v1959_v16 }
  0xfd   : > { %v1963_v21 = vpop.permute.xlu1 %1962  ;;  %v724_v22 = vpop.permute.xlu0 %723  ;;  %v1723_v23 = vpack.c.bf16 %v737_v18, %v704_v17  ;;  %v1725_v24 = vpack.c.bf16 %v736_v20, %v703_v19 }
  0xfe   : > { %v734_v26 = vsel %vm733_vm15, %v724_v22, %v1954_v11  ;;  %v1965_v28 = vunpack.i.h.bf16 %v1963_v21  ;;  %v1964_v29 = vunpack.i.l.bf16 %v1963_v21 }
  0xff   : > { %v1677_v27 = vpack.c.bf16 %v734_v26, %v701_v25  ;;  %1724 = vmatprep.subr.bf16.mxu1 %v1723_v23 }
 0x100   : > { %1726 = vmatpush1.bf16.msra.mxu1 %v1725_v24  ;;  %v768_v35 = vsel %vm766_vm0, %v1964_v29, %v1965_v28 }
 0x101   : > { %v1973_v7 = vpop.permute.xlu1 %1972  ;;  %v1968_v30 = vpop.permute.xlu0 %1967  ;;  %1678 = vmatpush1.bf16.msra.mxu0 %v1677_v27 }
 0x102   : > { %v1975_v31 = vunpack.i.h.bf16 %v1973_v7  ;;  %v1974_v32 = vunpack.i.l.bf16 %v1973_v7  ;;  %v1970_v33 = vunpack.i.h.bf16 %v1968_v30  ;;  %v1969_v34 = vunpack.i.l.bf16 %v1968_v30 }
 0x104   : > { %v801_v36 = vsel %vm799_vm1, %v1974_v32, %v1975_v31  ;;  %v770_v42 = vsel %vm766_vm0, %v1969_v34, %v1970_v33  ;;  %v769_v44 = vsel %vm766_vm0, %v1965_v28, %v1969_v34 }
 0x105   : > { %v757_v37 = vpop.permute.xlu1 %756  ;;  %v1978_v38 = vpop.permute.xlu0 %1977  ;;  %v1679_v39 = vpack.c.bf16 %v801_v36, %v768_v35 }
 0x106   : > { %v1980_v40 = vunpack.i.h.bf16 %v1978_v38  ;;  %v1979_v41 = vunpack.i.l.bf16 %v1978_v38  ;;  %v767_v50 = vsel %vm766_vm0, %v757_v37, %v1964_v29 }
 0x107   : > { %1680 = vmatprep.subr.bf16.mxu0 %v1679_v39 }
 0x108   : > { %v803_v43 = vsel %vm799_vm1, %v1979_v41, %v1980_v40  ;;  %v802_v45 = vsel %vm799_vm1, %v1975_v31, %v1979_v41 }
 0x109   : > { %v1983_v46 = vpop.permute.xlu1 %1982  ;;  %v790_v47 = vpop.permute.xlu0 %789  ;;  %v1727_v48 = vpack.c.bf16 %v803_v43, %v770_v42  ;;  %v1729_v49 = vpack.c.bf16 %v802_v45, %v769_v44 }
 0x10a   : > { %v800_v51 = vsel %vm799_vm1, %v790_v47, %v1974_v32  ;;  %v1985_v53 = vunpack.i.h.bf16 %v1983_v46  ;;  %v1984_v54 = vunpack.i.l.bf16 %v1983_v46 }
 0x10b   : > { %v1681_v52 = vpack.c.bf16 %v800_v51, %v767_v50  ;;  %1728 = vmatprep.subr.bf16.mxu1 %v1727_v48 }
 0x10c   : > { %1730 = vmatpush1.bf16.msra.mxu1 %v1729_v49  ;;  %v834_v61 = vsel %vm832_vm2, %v1984_v54, %v1985_v53 }
 0x10d   : > { %v1993_v55 = vpop.permute.xlu1 %1992  ;;  %v1988_v56 = vpop.permute.xlu0 %1987  ;;  %1682 = vmatpush1.bf16.msra.mxu0 %v1681_v52 }
 0x10e   : > { %v1995_v57 = vunpack.i.h.bf16 %v1993_v55  ;;  %v1994_v58 = vunpack.i.l.bf16 %v1993_v55  ;;  %v1990_v59 = vunpack.i.h.bf16 %v1988_v56  ;;  %v1989_v60 = vunpack.i.l.bf16 %v1988_v56 }
 0x110   : > { %v867_v62 = vsel %vm865_vm3, %v1994_v58, %v1995_v57  ;;  %v836_v9 = vsel %vm832_vm2, %v1989_v60, %v1990_v59  ;;  %v835_v11 = vsel %vm832_vm2, %v1985_v53, %v1989_v60 }
 0x111   : > { %v823_v63 = vpop.permute.xlu1 %822  ;;  %v1998_v3 = vpop.permute.xlu0 %1997  ;;  %v1683_v5 = vpack.c.bf16 %v867_v62, %v834_v61 }
 0x112   : > { %v2000_v6 = vunpack.i.h.bf16 %v1998_v3  ;;  %v1999_v8 = vunpack.i.l.bf16 %v1998_v3  ;;  %v833_v0 = vsel %vm832_vm2, %v823_v63, %v1984_v54 }
 0x113   : > { %1684 = vmatprep.subr.bf16.mxu0 %v1683_v5 }
 0x114   : > { %v869_v10 = vsel %vm865_vm3, %v1999_v8, %v2000_v6  ;;  %v868_v1 = vsel %vm865_vm3, %v1995_v57, %v1999_v8 }
 0x115   : > { %v2003_v12 = vpop.permute.xlu1 %2002  ;;  %v856_v4 = vpop.permute.xlu0 %855  ;;  %v1731_v2 = vpack.c.bf16 %v869_v10, %v836_v9  ;;  %v1733_v13 = vpack.c.bf16 %v868_v1, %v835_v11  ;;  %v1043_v1 = vld [vmem:[%s2484_s1] sm:$0xff] }
 0x116   : > { %v866_v14 = vsel %vm865_vm3, %v856_v4, %v1994_v58  ;;  %v2005_v16 = vunpack.i.h.bf16 %v2003_v12  ;;  %v2004_v17 = vunpack.i.l.bf16 %v2003_v12 }
 0x117   : > { %v1685_v15 = vpack.c.bf16 %v866_v14, %v833_v0  ;;  %1732 = vmatprep.subr.bf16.mxu1 %v1731_v2  ;;  %v2151_v0 = vmov 0.0   ;;  %v1302_v14 = vld [vmem:[%s2487_s4] sm:$0x3] }
 0x118   : > { %1734 = vmatpush1.bf16.msra.mxu1 %v1733_v13  ;;  %v900_v22 = vsel %vm898_vm4, %v2004_v17, %v2005_v16  ;;  %1305 = vperm.xlu1 %2042, %v1302_v14  }
 0x119   : > { %v2013_v18 = vpop.permute.xlu1 %2012  ;;  %v2008_v19 = vpop.permute.xlu0 %2007  ;;  %1686 = vmatpush1.bf16.msra.mxu0 %v1685_v15 }
 0x11a   : > { %v2015_v20 = vunpack.i.h.bf16 %v2013_v18  ;;  %v2014_v21 = vunpack.i.l.bf16 %v2013_v18  ;;  %v2010_v24 = vunpack.i.h.bf16 %v2008_v19  ;;  %v2009_v25 = vunpack.i.l.bf16 %v2008_v19 }
 0x11c   : > { %v933_v23 = vsel %vm931_vm5, %v2014_v21, %v2015_v20  ;;  %v902_v31 = vsel %vm898_vm4, %v2009_v25, %v2010_v24  ;;  %v901_v33 = vsel %vm898_vm4, %v2005_v16, %v2009_v25 }
 0x11d   : > { %v889_v26 = vpop.permute.xlu1 %888  ;;  %v1687_v27 = vpack.c.bf16 %v933_v23, %v900_v22 }
 0x11e   : > { %v2018_v28 = vpop.permute.xlu0 %2017  ;;  %v899_v38 = vsel %vm898_vm4, %v889_v26, %v2004_v17  ;;  %v1301_v26 = vld [vmem:[%s2486_s3] sm:$0x3] }
 0x11f   : > { %v2020_v29 = vunpack.i.h.bf16 %v2018_v28  ;;  %v2019_v7 = vunpack.i.l.bf16 %v2018_v28  ;;  %1688 = vmatprep.subr.bf16.mxu0 %v1687_v27 }
 0x121   : > { %v2023_v30 = vpop.permute.xlu1 %2022  ;;  %v935_v32 = vsel %vm931_vm5, %v2019_v7, %v2020_v29  ;;  %v934_v34 = vsel %vm931_vm5, %v2015_v20, %v2019_v7 }
 0x122   : > { %v922_v35 = vpop.permute.xlu0 %921  ;;  %v1735_v36 = vpack.c.bf16 %v935_v32, %v902_v31  ;;  %v1737_v37 = vpack.c.bf16 %v934_v34, %v901_v33  ;;  %v2025_v40 = vunpack.i.h.bf16 %v2023_v30  ;;  %v2024_v41 = vunpack.i.l.bf16 %v2023_v30 }
 0x123   : > { %v932_v39 = vsel %vm931_vm5, %v922_v35, %v2014_v21 }
 0x124   : > { %v1689_v42 = vpack.c.bf16 %v932_v39, %v899_v38  ;;  %1736 = vmatprep.subr.bf16.mxu1 %v1735_v36  ;;  %v966_v47 = vsel %vm964_vm6, %v2024_v41, %v2025_v40 }
 0x125   : > { %1738 = vmatpush1.bf16.msra.mxu1 %v1737_v37  ;;  %v2033_v43 = vpop.permute.xlu1 %2032 }
 0x126   : > { %v2035_v44 = vunpack.i.h.bf16 %v2033_v43  ;;  %v2034_v45 = vunpack.i.l.bf16 %v2033_v43  ;;  %v2028_v46 = vpop.permute.xlu0 %2027  ;;  %1690 = vmatpush1.bf16.msra.mxu0 %v1689_v42 }
 0x127   : > { %v2030_v49 = vunpack.i.h.bf16 %v2028_v46  ;;  %v2029_v50 = vunpack.i.l.bf16 %v2028_v46 }
 0x128   : > { %v999_v48 = vsel %vm997_vm7, %v2034_v45, %v2035_v44 }
 0x129   : > { %v955_v51 = vpop.permute.xlu1 %954  ;;  %v1691_v52 = vpack.c.bf16 %v999_v48, %v966_v47  ;;  %v968_v57 = vsel %vm964_vm6, %v2029_v50, %v2030_v49  ;;  %v967_v59 = vsel %vm964_vm6, %v2025_v40, %v2029_v50 }
 0x12a   : > { %v2038_v53 = vpop.permute.xlu0 %2037  ;;  %v965_v3 = vsel %vm964_vm6, %v955_v51, %v2024_v41 }
 0x12b   : > { %v2040_v54 = vunpack.i.h.bf16 %v2038_v53  ;;  %v2039_v55 = vunpack.i.l.bf16 %v2038_v53  ;;  %1692 = vmatprep.subr.bf16.mxu0 %v1691_v52 }
 0x12d   : > { %v1023_v56 = vpop.permute.xlu1 %1022  ;;  %v1001_v58 = vsel %vm997_vm7, %v2039_v55, %v2040_v54  ;;  %v1000_v60 = vsel %vm997_vm7, %v2035_v44, %v2039_v55  ;;  %v1478_v54 = vld [vmem:[%s2265_s10 + $0x8] sm:$0xf]  ;;  %v1482_v55 = vld [vmem:[%s2265_s10 + $0x8] sm:$0xf0] }
 0x12e   : > { %v988_v61 = vpop.permute.xlu0 %987  ;;  %v1739_v62 = vpack.c.bf16 %v1001_v58, %v968_v57  ;;  %v1741_v63 = vpack.c.bf16 %v1000_v60, %v967_v59  ;;  %v1483_v60 = vld [vmem:[%s2265_s10 + $0x10] sm:$0xf0] }
 0x12f   : > { %v998_v5 = vsel %vm997_vm7, %v988_v61, %v2034_v45  ;;  %v1486_v45 = vlaneseq }
 0x130   : > { %v1693_v6 = vpack.c.bf16 %v998_v5, %v965_v3  ;;  %1740 = vmatprep.subr.bf16.mxu1 %v1739_v62  ;;  %v1484_v62 = vld [vmem:[%s2265_s10 + $0x18] sm:$0xf0] }
 0x131   : > { %1742 = vmatpush1.bf16.msra.mxu1 %v1741_v63  ;;  %v1027_v8 = vpop.permute.xlu1 %1026  ;;  %v1487_v50 = vshrl.u32 %v1486_v45, 7 }
 0x132   : > { %v1025_v9 = vpop.permute.xlu0 %1024  ;;  %1694 = vmatpush1.bf16.msra.mxu0 %v1693_v6 }
 0x133   : > { %v1032_v10 = vsel %vm1030_vm8, %v1023_v56, %v1025_v9  ;;  %v1033_v13 = vsel %vm1030_vm8, %v1025_v9, %v1027_v8  ;;  %v1488_v51 = vsub.s32 0, %v1487_v50  ;;  %v1508_v52 = vsub.s32 1, %v1487_v50 }
 0x134   : > { %1203 = vmatprep.subr.mxu0 %v1032_v10 }
 0x135   : > { %v1021_v11 = vpop.permute.xlu1 %1020 }
 0x136   : > { %v1029_v12 = vpop.permute.xlu0 %1028  ;;  %v1031_v4 = vsel %vm1030_vm8, %v1021_v11, %v1023_v56 }
 0x137   : > { %1204 = vmatpush1.msra.mxu0 %v1031_v4  ;;  %v1034_v2 = vsel %vm1030_vm8, %v1027_v8, %v1029_v12  ;;  %v1480_v12 = vld [vmem:[%s2265_s10 + $0x18] sm:$0xf] }
 0x138   : > { %1274 = vmatprep.subr.mxu1 %v1034_v2  ;;  %1220 = vmatmul.mubr.f32.vlgmr.msra.gmra.mrb[0].mxu0 %v1043_v1 }
 0x139   : > { %1275 = vmatpush1.msra.mxu1 %v1033_v13  ;;  %1376 = vmatprep.mubr.f32.mxu0 %v2151_v0  ;;  %v1485_v13 = vld [vmem:[%s2265_s10 + $0x20] sm:$0xf0] }
 0x13a   : > { %1291 = vmatmul.mubr.f32.vlgmr.msra.gmra.mrb[0].mxu1 %v1043_v1  ;;  %v1479_v1 = vld [vmem:[%s2265_s10 + $0x10] sm:$0xf] }
 0x13b   : > { %1447 = vmatprep.mubr.f32.mxu1 %v2151_v0 }
 0x147   : > { %v1149_v15 = vpop.permute.xlu0 %1148 }
 0x197   : > { %v1306_v29 = vpop.permute.xlu1 %1305 }
 0x20b   : > { %v1221_v16 = vpop.f32.mrb[0].mxu0 }
 0x20c   : > { %v1222_v17 = vadd.f32 %v1221_v16, %v1149_v15  ;;  %v1223_v18 = vpop.f32.mrb[1].mxu0 }
 0x20d   : > { %v1224_v19 = vadd.f32 %v1223_v18, %v1149_v15  ;;  %v1292_v20 = vpop.f32.mrb[0].mxu1 }
 0x20e   : > { %v1297_v21 = vmax.f32 %v1222_v17, 0.0  ;;  %v1293_v22 = vadd.f32 %v1292_v20, %v1149_v15  ;;  %v1294_v23 = vpop.f32.mrb[1].mxu1 }
 0x20f   : > { %v1298_v24 = vmax.f32 %v1224_v19, 0.0  ;;  %v1295_v25 = vadd.f32 %v1294_v23, %v1149_v15  ;;  %v1481_v19 = vld [vmem:[%s2265_s10 + $0x20] sm:$0xf] }
 0x210   : > { %v1299_v28 = vmax.f32 %v1293_v22, 0.0 }
 0x211   : > { %v1300_v27 = vmax.f32 %v1295_v25, 0.0  ;;  %1312 = vmatprep.subr.mxu0 %v1298_v24 }
 0x212   : > { %1313 = vmatpush1.msra.mxu0 %v1297_v21 }
 0x213   : > { %1383 = vmatprep.subr.mxu1 %v1300_v27  ;;  %1638 = vmatmul.mubr.msk.f32.vlgmr.msra.gmra.mrb[2].mxu0 %vm1308_vm9, %v1301_v26 }
 0x214   : > { %1384 = vmatpush1.msra.mxu1 %v1299_v28 }
 0x215   : > { %1639 = vmatmul.mubr.msk.f32.vlgmr.msra.gmra.mrb[2].mxu1 %vm1308_vm9, %v1301_v26 }
 0x2e6   : > { %v1378_v7 = vpop.f32.mrb[2].mxu0 }
 0x2e7   : > { %v1379_v30 = vadd.f32 %v1378_v7, %v1306_v29  ;;  %v1380_v31 = vpop.f32.mrb[3].mxu0 }
 0x2e8   : > { %v1449_v32 = vpop.f32.mrb[2].mxu1  ;;  %v1381_v33 = vadd.f32 %v1380_v31, %v1306_v29 }
 0x2e9   : > { %v1450_v34 = vadd.f32 %v1449_v32, %v1306_v29  ;;  %v1640_v35 = vmul.f32 -1.442695, %v1379_v30  ;;  %v1451_v36 = vpop.f32.mrb[3].mxu1 }
 0x2ea   : > { %v1641_v37 = vmul.f32 -1.442695, %v1381_v33  ;;  %v1452_v38 = vadd.f32 %v1451_v36, %v1306_v29 }
 0x2eb   : > { %2043 = vpow2.f32 %v1640_v35  ;;  %v1642_v39 = vmul.f32 -1.442695, %v1450_v34 }
 0x2ec   : > { %2045 = vpow2.f32 %v1641_v37  ;;  %v1643_v40 = vmul.f32 -1.442695, %v1452_v38 }
 0x2ed   : > { %2047 = vpow2.f32 %v1642_v39 }
 0x2ee   : > { %2049 = vpow2.f32 %v1643_v40 }
 0x2f5   : > { %v2044_v41 = vpop.eup %2043 }
 0x2f6   : > { %v2046_v42 = vpop.eup %2045  ;;  %v1466_v43 = vadd.f32 1.0, %v2044_v41 }
 0x2f7   : > { %v2048_v44 = vpop.eup %2047  ;;  %v1467_v46 = vadd.f32 1.0, %v2046_v42 }
 0x2f8   : > { %v2050_v47 = vpop.eup %2049  ;;  %v1468_v48 = vadd.f32 1.0, %v2048_v44  ;;  %2051 = vrcp.f32 %v1466_v43 }
 0x2f9   : > { %2053 = vrcp.f32 %v1467_v46  ;;  %v1469_v49 = vadd.f32 1.0, %v2050_v47 }
 0x2fa   : > { %2055 = vrcp.f32 %v1468_v48 }
 0x2fb   : > { %2057 = vrcp.f32 %v1469_v49 }
 0x302   : > { %v2052_v53 = vpop.eup %2051 }
 0x303   : > { %v2054_v56 = vpop.eup %2053  ;;  %v1489_v57 = vrot.slane %v2052_v53, %v1488_v51  ;;  %v1509_v58 = vrot.slane %v2052_v53, %v1508_v52  ;;  %v1550_v59 = vrot.slane %v2052_v53, 4 }
 0x304   : > { %v2056_v61 = vpop.eup %2055  ;;  %v1493_v63 = vrot.slane %v2054_v56, %v1488_v51  ;;  %v1513_v3 = vrot.slane %v2054_v56, %v1508_v52  ;;  %v1551_v5 = vrot.slane %v2054_v56, 4 }
 0x305   : > { %v2058_v6 = vpop.eup %2057  ;;  %v1497_v8 = vrot.slane %v2056_v61, %v1488_v51  ;;  %v1502_v9 = vmul.f32 %v1489_v57, %v1478_v54  ;;  %v1517_v10 = vrot.slane %v2056_v61, %v1508_v52  ;;  %v1522_v11 = vmul.f32 %v1509_v58, %v1482_v55  ;;  %1558 = vst [vmem:[%s2452_s8] sm:$0x30] %v1550_v59 }
 0x306   : > { %v1552_v4 = vrot.slane %v2056_v61, 4  ;;  %v1523_v2 = vmul.f32 %v1513_v3, %v1483_v60  ;;  %1559 = vst [vmem:[%s2452_s8 + $0x8] sm:$0x30] %v1551_v5  ;;  %v1501_v15 = vrot.slane %v2058_v6, %v1488_v51  ;;  %v1521_v16 = vrot.slane %v2058_v6, %v1508_v52 }
 0x307   : > { %v1524_v0 = vmul.f32 %v1517_v10, %v1484_v62  ;;  %v1530_v14 = vrot.slane %v1522_v11, 4  ;;  %v1503_v17 = vmul.f32 %v1493_v63, %v1479_v1  ;;  %v1553_v20 = vrot.slane %v2058_v6, 4 }
 0x308   : > { %1560 = vst [vmem:[%s2452_s8 + $0x10] sm:$0x30] %v1552_v4  ;;  %v1531_v18 = vrot.slane %v1523_v2, 4  ;;  %v1504_v21 = vmul.f32 %v1497_v8, %v1480_v12  ;;  %v1525_v24 = vmul.f32 %v1521_v16, %v1485_v13  ;;  %v1505_v27 = vmul.f32 %v1501_v15, %v1481_v19 }
 0x309   : > { %v1532_v22 = vrot.slane %v1524_v0, 4  ;;  %v1538_v23 = vadd.f32 %v1530_v14, %v1502_v9  ;;  %1561 = vst [vmem:[%s2452_s8 + $0x18] sm:$0x30] %v1553_v20 }
 0x30a   : > { %v1539_v25 = vadd.f32 %v1531_v18, %v1503_v17  ;;  %v1533_v28 = vrot.slane %v1525_v24, 4 }
 0x30b   : > { %v1540_v26 = vadd.f32 %v1532_v22, %v1504_v21  ;;  %1542 = vst [vmem:[%s2452_s8] sm:$0xf] %v1538_v23 }
 0x30c   : > { %1543 = vst [vmem:[%s2452_s8 + $0x8] sm:$0xf] %v1539_v25  ;;  %v1541_v29 = vadd.f32 %v1533_v28, %v1505_v27 }
 0x30d   : > { %1544 = vst [vmem:[%s2452_s8 + $0x10] sm:$0xf] %v1540_v26 }
 0x30e   : > { %1545 = vst [vmem:[%s2452_s8 + $0x18] sm:$0xf] %v1541_v29 }
 0x30f PF: > { %p15_p8 = scmp.ge.s32.totalorder %s2204_s23, 4   ;;  %s2492_s18 = smov %s2115_s19 }
 0x310   : > { %s2493_s19 = smov %s2119_s20  ;;  %s2494_s20 = smov %s2214_s26 }
 0x311   : > { %s2495_s21 = smov %s2204_s23  ;;  %17 = sbr.rel (!%p15_p8) target bundleno = 3 (0x3), region = 80 }
 0x318   :  { %1583 = vsyncpa [#allocation4], 1 }
 0x319   :  { %1585 = vsyncpa [#allocation4 + $0x1], 1 }

</bundles_post_ra>
